<compile_context>
chip_gen: v7x
topology: tpu7x:2x2x1
jax: 0.10.0
libtpu: 0.0.40
codegen_flags: <defaults>
</compile_context>

<pallas_src>
import jax
import jax.numpy as jnp
import numpy as np
from jax import lax
from jax.experimental import pallas as pl
from jax.experimental.pallas import tpu as pltpu


def lstm_classifier_kernel(sent_ref, wcomb_ref, whh_ref, wl_ref, bl_ref,
                           out_ref, y_ref, gx_scr):
    T, Bp, Hp = out_ref.shape
    Vp = wcomb_ref.shape[0]
    TB = T * Bp

    # ---- fused embedding gather + input projection + bias: ONE MXU matmul --
    # W_comb[v] = emb[v] @ W_ih + b was precomputed in the wrapper, so the
    # one-hot gather directly produces the per-step input gates gx.
    ids = sent_ref[...]                                    # (T*Bp, 1) int32
    iota = lax.broadcasted_iota(jnp.int32, (TB, Vp), 1)
    onehot = (ids == iota).astype(jnp.float32)             # (T*Bp, Vp) 0/1
    gx_scr[...] = jnp.dot(onehot, wcomb_ref[...],
                          preferred_element_type=jnp.float32)  # (T*Bp, 4*Hp)

    # ---- recurrence weights: load once, reuse across all T steps -----------
    whh = whh_ref[...]                                     # (Hp, 4*Hp)

    # ---- recurrence, statically unrolled; h/c carried in registers ---------
    h = jnp.zeros((Bp, Hp), jnp.float32)
    c = jnp.zeros((Bp, Hp), jnp.float32)
    for t in range(T):                                     # T static -> unrolled
        gates = (gx_scr[pl.ds(t * Bp, Bp), :]              # sublane-aligned slice
                 + jnp.dot(h, whh,
                           preferred_element_type=jnp.float32))  # (Bp, 4*Hp)
        # PyTorch gate order i, f, g, o; Hp == 128 so each slice is one vreg.
        i = jax.nn.sigmoid(gates[:, 0 * Hp:1 * Hp])
        f = jax.nn.sigmoid(gates[:, 1 * Hp:2 * Hp])
        g = jnp.tanh(gates[:, 2 * Hp:3 * Hp])
        o = jax.nn.sigmoid(gates[:, 3 * Hp:4 * Hp])
        c = f * c + i * g
        h = o * jnp.tanh(c)
        out_ref[t] = h                                     # lane-dense VMEM store

    # ---- hidden2label on the last hidden state (lane-dense, Lp=128) --------
    y_ref[...] = (jnp.dot(h, wl_ref[...], preferred_element_type=jnp.float32)
                  + bl_ref[...])


def _round_up(x, m):
    return ((x + m - 1) // m) * m


@jax.jit
def rnn_classifier_forward(sentence, params):
    """sentence: int32 [T, B]. Returns (y [B, L], lstm_out [T, B, H])."""
    emb = params["embedding"].astype(jnp.float32)   # (V, E)
    w_ih = params["w_ih"]                           # (E, 4H)
    w_hh = params["w_hh"]                           # (H, 4H)
    b = params["b"]                                 # (1, 4H) = bias_ih + bias_hh
    w_l = params["w_label"]                         # (H, L)
    b_l = params["b_label"]                         # (1, L)

    T, B = sentence.shape
    V, E = emb.shape
    H = w_hh.shape[0]
    L = w_l.shape[1]

    Bp = _round_up(max(B, 8), 8)    # sublane-pad batch
    Hp = 128                        # lane-pad hidden -> vreg-aligned gate slices
    Lp = 128                        # lane-pad labels -> lane-dense y store
    Vp = _round_up(V, 128)          # lane-pad vocab (K axis of one-hot matmul)
    assert H <= Hp, "kernel supports hidden_dim <= 128"
    assert L <= Lp, "kernel supports label_size <= 128"

    # Fused embedding/input-projection table: W_comb[v] = emb[v] @ W_ih + b.
    # Row-wise identical arithmetic to gathering then projecting, so numerics
    # match the reference. Padded per gate; padded hidden columns stay zero so
    # padded hidden units remain exactly h = c = 0 through the recurrence.
    w_comb = jnp.dot(emb, w_ih) + b                                    # (V, 4H)
    w_comb_p = (jnp.zeros((Vp, 4, Hp), jnp.float32)
                .at[:V, :, :H].set(w_comb.reshape(V, 4, H)).reshape(Vp, 4 * Hp))
    w_hh_p = (jnp.zeros((Hp, 4, Hp), jnp.float32)
              .at[:H, :, :H].set(w_hh.reshape(H, 4, H)).reshape(Hp, 4 * Hp))
    w_l_p = jnp.zeros((Hp, Lp), jnp.float32).at[:H, :L].set(w_l)
    b_l_p = jnp.zeros((1, Lp), jnp.float32).at[:, :L].set(b_l)

    sent_p = jnp.zeros((T, Bp), jnp.int32).at[:, :B].set(sentence)
    sent_flat = sent_p.reshape(T * Bp, 1)

    lstm_out_p, y_p = pl.pallas_call(
        lstm_classifier_kernel,
        out_shape=(
            jax.ShapeDtypeStruct((T, Bp, Hp), jnp.float32),   # padded lstm_out
            jax.ShapeDtypeStruct((Bp, Lp), jnp.float32),      # padded y
        ),
        in_specs=[pl.BlockSpec(memory_space=pltpu.MemorySpace.VMEM)] * 5,
        out_specs=(pl.BlockSpec(memory_space=pltpu.MemorySpace.VMEM),
                   pl.BlockSpec(memory_space=pltpu.MemorySpace.VMEM)),
        scratch_shapes=[pltpu.VMEM((T * Bp, 4 * Hp), jnp.float32)],  # gates_x
    )(sent_flat, w_comb_p, w_hh_p, w_l_p, b_l_p)

    y = y_p[:B, :L]
    lstm_out = lstm_out_p[:, :B, :H]
    return y, lstm_out


def reference_forward(sentence, params):
    """Pure-JAX reference (matches PyTorch nn.LSTM semantics, zero init state)."""
    emb = params["embedding"]
    w_ih, w_hh, b = params["w_ih"], params["w_hh"], params["b"]
    w_l, b_l = params["w_label"], params["b_label"]
    H = w_hh.shape[0]

    x = jnp.take(emb, sentence, axis=0).astype(jnp.float32)   # (T, B, E)
    B = x.shape[1]
    h0 = jnp.zeros((B, H), jnp.float32)
    c0 = jnp.zeros((B, H), jnp.float32)

    def step(carry, x_t):
        h, c = carry
        gates = x_t @ w_ih + h @ w_hh + b[0]
        i = jax.nn.sigmoid(gates[:, 0 * H:1 * H])
        f = jax.nn.sigmoid(gates[:, 1 * H:2 * H])
        g = jnp.tanh(gates[:, 2 * H:3 * H])
        o = jax.nn.sigmoid(gates[:, 3 * H:4 * H])
        c = f * c + i * g
        h = o * jnp.tanh(c)
        return (h, c), h

    (_, _), hs = lax.scan(step, (h0, c0), x)
    y = hs[-1] @ w_l + b_l[0]
    return y, hs


def init_params(key, vocab_size, embedding_dim, hidden_dim, label_size):
    ks = jax.random.split(key, 7)
    bound = 1.0 / np.sqrt(hidden_dim)
    return {
        # nn.Embedding default: N(0, 1)
        "embedding": jax.random.normal(ks[0], (vocab_size, embedding_dim), jnp.float32),
        # nn.LSTM default: U(-1/sqrt(H), 1/sqrt(H)); stored transposed [in, 4H]
        "w_ih": jax.random.uniform(ks[1], (embedding_dim, 4 * hidden_dim),
                                   jnp.float32, -bound, bound),
        "w_hh": jax.random.uniform(ks[2], (hidden_dim, 4 * hidden_dim),
                                   jnp.float32, -bound, bound),
        "b": (jax.random.uniform(ks[3], (1, 4 * hidden_dim), jnp.float32, -bound, bound)
              + jax.random.uniform(ks[4], (1, 4 * hidden_dim), jnp.float32, -bound, bound)),
        # nn.Linear(hidden, label): stored transposed [H, L]
        "w_label": jax.random.uniform(ks[5], (hidden_dim, label_size),
                                      jnp.float32, -bound, bound),
        "b_label": jax.random.uniform(ks[6], (1, label_size),
                                      jnp.float32, -bound, bound),
    }


if __name__ == "__main__":
    SEQ_LEN = 8
    BATCH = 2
    EMB_DIM = 32
    HIDDEN = 32
    VOCAB = 50
    LABELS = 4

    key = jax.random.PRNGKey(0)
    k_param, k_tok = jax.random.split(key)
    params = init_params(k_param, VOCAB, EMB_DIM, HIDDEN, LABELS)

    sentence = jax.random.randint(k_tok, (SEQ_LEN, BATCH), 0, VOCAB, dtype=jnp.int32)

    y, lstm_out = rnn_classifier_forward(sentence, params)
    y = jax.block_until_ready(y)
    lstm_out = jax.block_until_ready(lstm_out)

    y_ref, lstm_out_ref = reference_forward(sentence, params)
    np.testing.assert_allclose(np.asarray(y), np.asarray(y_ref), atol=1e-5, rtol=1e-5)
    np.testing.assert_allclose(np.asarray(lstm_out), np.asarray(lstm_out_ref),
                               atol=1e-5, rtol=1e-5)

    assert y.shape == (BATCH, LABELS)
    assert lstm_out.shape == (SEQ_LEN, BATCH, HIDDEN)
    print("KERNEL_OK")
</pallas_src>

<mosaic_0001>
module attributes {stable_mosaic.version = 11 : i64} {
  func.func @lstm_classifier_kernel(%arg0: memref<64x1xi32, #tpu.memory_space<vmem>>, %arg1: memref<128x512xf32, #tpu.memory_space<vmem>>, %arg2: memref<128x512xf32, #tpu.memory_space<vmem>>, %arg3: memref<128x128xf32, #tpu.memory_space<vmem>>, %arg4: memref<1x128xf32, #tpu.memory_space<vmem>>, %arg5: memref<8x8x128xf32, #tpu.memory_space<vmem>>, %arg6: memref<8x128xf32, #tpu.memory_space<vmem>>, %arg7: memref<64x512xf32, #tpu.memory_space<vmem>>) attributes {dimension_semantics = [], scalar_prefetch = 0 : i64, scratch_operands = 1 : i64, tpu.core_type = #tpu.core_type<tc>} {
    %c0 = arith.constant 0 : index
    %c0_0 = arith.constant 0 : index
    %0 = vector.load %arg0[%c0, %c0_0] : memref<64x1xi32, #tpu.memory_space<vmem>>, vector<64x1xi32>
    %1 = tpu.iota {dimensions = array<i32: 1>} : vector<64x128xi32>
    %2 = vector.broadcast %0 : vector<64x1xi32> to vector<64x128xi32>
    %3 = arith.cmpi eq, %2, %1 : vector<64x128xi32>
    %4 = arith.extui %3 : vector<64x128xi1> to vector<64x128xi32>
    %5 = arith.sitofp %4 : vector<64x128xi32> to vector<64x128xf32>
    %c0_1 = arith.constant 0 : index
    %c0_2 = arith.constant 0 : index
    %6 = vector.load %arg1[%c0_1, %c0_2] : memref<128x512xf32, #tpu.memory_space<vmem>>, vector<128x512xf32>
    %cst = arith.constant dense<0.000000e+00> : vector<64x512xf32>
    %7 = tpu.matmul %5, %6, %cst {dimension_numbers = #tpu.dot_dimension_numbers<[1], [0], [0], [1], [0, 0, 1, 1], [], []>} : vector<64x128xf32>, vector<128x512xf32>, vector<64x512xf32> -> vector<64x512xf32>
    %c0_3 = arith.constant 0 : index
    %c0_4 = arith.constant 0 : index
    %8 = vector.load %arg7[%c0_3, %c0_4] : memref<64x512xf32, #tpu.memory_space<vmem>>, vector<64x512xf32>
    tpu.vector_store %arg7[%c0_3, %c0_4], %7 {strides = array<i32>} : memref<64x512xf32, #tpu.memory_space<vmem>>, vector<64x512xf32>,
    %c0_5 = arith.constant 0 : index
    %c0_6 = arith.constant 0 : index
    %9 = vector.load %arg2[%c0_5, %c0_6] : memref<128x512xf32, #tpu.memory_space<vmem>>, vector<128x512xf32>
    %cst_7 = arith.constant 0.000000e+00 : f32
    %10 = vector.broadcast %cst_7 : f32 to vector<8x128xf32>
    %cst_8 = arith.constant 0.000000e+00 : f32
    %11 = vector.broadcast %cst_8 : f32 to vector<8x128xf32>
    %c0_9 = arith.constant 0 : index
    %c0_10 = arith.constant 0 : index
    %12 = vector.load %arg7[%c0_9, %c0_10] : memref<64x512xf32, #tpu.memory_space<vmem>>, vector<8x512xf32>
    %cst_11 = arith.constant dense<0.000000e+00> : vector<8x512xf32>
    %13 = tpu.matmul %10, %9, %cst_11 {dimension_numbers = #tpu.dot_dimension_numbers<[1], [0], [0], [1], [0, 0, 1, 1], [], []>} : vector<8x128xf32>, vector<128x512xf32>, vector<8x512xf32> -> vector<8x512xf32>
    %14 = arith.addf %12, %13 : vector<8x512xf32>
    %15 = vector.extract_strided_slice %14 {offsets = [0, 0], sizes = [8, 128], strides = [1, 1]} : vector<8x512xf32> to vector<8x128xf32>
    %16 = arith.negf %15 : vector<8x128xf32>
    %17 = math.exp %16 : vector<8x128xf32>
    %cst_12 = arith.constant 1.000000e+00 : f32
    %18 = vector.broadcast %cst_12 : f32 to vector<8x128xf32>
    %19 = arith.addf %18, %17 : vector<8x128xf32>
    %20 = arith.divf %18, %19 : vector<8x128xf32>
    %21 = vector.extract_strided_slice %14 {offsets = [0, 128], sizes = [8, 128], strides = [1, 1]} : vector<8x512xf32> to vector<8x128xf32>
    %22 = arith.negf %21 : vector<8x128xf32>
    %23 = math.exp %22 : vector<8x128xf32>
    %cst_13 = arith.constant 1.000000e+00 : f32
    %24 = vector.broadcast %cst_13 : f32 to vector<8x128xf32>
    %25 = arith.addf %24, %23 : vector<8x128xf32>
    %26 = arith.divf %24, %25 : vector<8x128xf32>
    %27 = vector.extract_strided_slice %14 {offsets = [0, 256], sizes = [8, 128], strides = [1, 1]} : vector<8x512xf32> to vector<8x128xf32>
    %28 = math.tanh %27 : vector<8x128xf32>
    %29 = vector.extract_strided_slice %14 {offsets = [0, 384], sizes = [8, 128], strides = [1, 1]} : vector<8x512xf32> to vector<8x128xf32>
    %30 = arith.negf %29 : vector<8x128xf32>
    %31 = math.exp %30 : vector<8x128xf32>
    %cst_14 = arith.constant 1.000000e+00 : f32
    %32 = vector.broadcast %cst_14 : f32 to vector<8x128xf32>
    %33 = arith.addf %32, %31 : vector<8x128xf32>
    %34 = arith.divf %32, %33 : vector<8x128xf32>
    %35 = arith.mulf %26, %11 : vector<8x128xf32>
    %36 = arith.mulf %20, %28 : vector<8x128xf32>
    %37 = arith.addf %35, %36 : vector<8x128xf32>
    %38 = math.tanh %37 : vector<8x128xf32>
    %39 = arith.mulf %34, %38 : vector<8x128xf32>
    %c0_15 = arith.constant 0 : index
    %c0_16 = arith.constant 0 : index
    %c0_17 = arith.constant 0 : index
    %40 = vector.load %arg5[%c0_15, %c0_16, %c0_17] : memref<8x8x128xf32, #tpu.memory_space<vmem>>, vector<1x8x128xf32>
    %41 = vector.shape_cast %40 : vector<1x8x128xf32> to vector<8x128xf32>
    %42 = vector.shape_cast %39 : vector<8x128xf32> to vector<1x8x128xf32>
    tpu.vector_store %arg5[%c0_15, %c0_16, %c0_17], %42 {strides = array<i32>} : memref<8x8x128xf32, #tpu.memory_space<vmem>>, vector<1x8x128xf32>,
    %c8 = arith.constant 8 : index
    %c0_18 = arith.constant 0 : index
    %43 = vector.load %arg7[%c8, %c0_18] : memref<64x512xf32, #tpu.memory_space<vmem>>, vector<8x512xf32>
    %cst_19 = arith.constant dense<0.000000e+00> : vector<8x512xf32>
    %44 = tpu.matmul %39, %9, %cst_19 {dimension_numbers = #tpu.dot_dimension_numbers<[1], [0], [0], [1], [0, 0, 1, 1], [], []>} : vector<8x128xf32>, vector<128x512xf32>, vector<8x512xf32> -> vector<8x512xf32>
    %45 = arith.addf %43, %44 : vector<8x512xf32>
    %46 = vector.extract_strided_slice %45 {offsets = [0, 0], sizes = [8, 128], strides = [1, 1]} : vector<8x512xf32> to vector<8x128xf32>
    %47 = arith.negf %46 : vector<8x128xf32>
    %48 = math.exp %47 : vector<8x128xf32>
    %cst_20 = arith.constant 1.000000e+00 : f32
    %49 = vector.broadcast %cst_20 : f32 to vector<8x128xf32>
    %50 = arith.addf %49, %48 : vector<8x128xf32>
    %51 = arith.divf %49, %50 : vector<8x128xf32>
    %52 = vector.extract_strided_slice %45 {offsets = [0, 128], sizes = [8, 128], strides = [1, 1]} : vector<8x512xf32> to vector<8x128xf32>
    %53 = arith.negf %52 : vector<8x128xf32>
    %54 = math.exp %53 : vector<8x128xf32>
    %cst_21 = arith.constant 1.000000e+00 : f32
    %55 = vector.broadcast %cst_21 : f32 to vector<8x128xf32>
    %56 = arith.addf %55, %54 : vector<8x128xf32>
    %57 = arith.divf %55, %56 : vector<8x128xf32>
    %58 = vector.extract_strided_slice %45 {offsets = [0, 256], sizes = [8, 128], strides = [1, 1]} : vector<8x512xf32> to vector<8x128xf32>
    %59 = math.tanh %58 : vector<8x128xf32>
    %60 = vector.extract_strided_slice %45 {offsets = [0, 384], sizes = [8, 128], strides = [1, 1]} : vector<8x512xf32> to vector<8x128xf32>
    %61 = arith.negf %60 : vector<8x128xf32>
    %62 = math.exp %61 : vector<8x128xf32>
    %cst_22 = arith.constant 1.000000e+00 : f32
    %63 = vector.broadcast %cst_22 : f32 to vector<8x128xf32>
    %64 = arith.addf %63, %62 : vector<8x128xf32>
    %65 = arith.divf %63, %64 : vector<8x128xf32>
    %66 = arith.mulf %57, %37 : vector<8x128xf32>
    %67 = arith.mulf %51, %59 : vector<8x128xf32>
    %68 = arith.addf %66, %67 : vector<8x128xf32>
    %69 = math.tanh %68 : vector<8x128xf32>
    %70 = arith.mulf %65, %69 : vector<8x128xf32>
    %c1 = arith.constant 1 : index
    %c0_23 = arith.constant 0 : index
    %c0_24 = arith.constant 0 : index
    %71 = vector.load %arg5[%c1, %c0_23, %c0_24] : memref<8x8x128xf32, #tpu.memory_space<vmem>>, vector<1x8x128xf32>
    %72 = vector.shape_cast %71 : vector<1x8x128xf32> to vector<8x128xf32>
    %73 = vector.shape_cast %70 : vector<8x128xf32> to vector<1x8x128xf32>
    tpu.vector_store %arg5[%c1, %c0_23, %c0_24], %73 {strides = array<i32>} : memref<8x8x128xf32, #tpu.memory_space<vmem>>, vector<1x8x128xf32>,
    %c16 = arith.constant 16 : index
    %c0_25 = arith.constant 0 : index
    %74 = vector.load %arg7[%c16, %c0_25] : memref<64x512xf32, #tpu.memory_space<vmem>>, vector<8x512xf32>
    %cst_26 = arith.constant dense<0.000000e+00> : vector<8x512xf32>
    %75 = tpu.matmul %70, %9, %cst_26 {dimension_numbers = #tpu.dot_dimension_numbers<[1], [0], [0], [1], [0, 0, 1, 1], [], []>} : vector<8x128xf32>, vector<128x512xf32>, vector<8x512xf32> -> vector<8x512xf32>
    %76 = arith.addf %74, %75 : vector<8x512xf32>
    %77 = vector.extract_strided_slice %76 {offsets = [0, 0], sizes = [8, 128], strides = [1, 1]} : vector<8x512xf32> to vector<8x128xf32>
    %78 = arith.negf %77 : vector<8x128xf32>
    %79 = math.exp %78 : vector<8x128xf32>
    %cst_27 = arith.constant 1.000000e+00 : f32
    %80 = vector.broadcast %cst_27 : f32 to vector<8x128xf32>
    %81 = arith.addf %80, %79 : vector<8x128xf32>
    %82 = arith.divf %80, %81 : vector<8x128xf32>
    %83 = vector.extract_strided_slice %76 {offsets = [0, 128], sizes = [8, 128], strides = [1, 1]} : vector<8x512xf32> to vector<8x128xf32>
    %84 = arith.negf %83 : vector<8x128xf32>
    %85 = math.exp %84 : vector<8x128xf32>
    %cst_28 = arith.constant 1.000000e+00 : f32
    %86 = vector.broadcast %cst_28 : f32 to vector<8x128xf32>
    %87 = arith.addf %86, %85 : vector<8x128xf32>
    %88 = arith.divf %86, %87 : vector<8x128xf32>
    %89 = vector.extract_strided_slice %76 {offsets = [0, 256], sizes = [8, 128], strides = [1, 1]} : vector<8x512xf32> to vector<8x128xf32>
    %90 = math.tanh %89 : vector<8x128xf32>
    %91 = vector.extract_strided_slice %76 {offsets = [0, 384], sizes = [8, 128], strides = [1, 1]} : vector<8x512xf32> to vector<8x128xf32>
    %92 = arith.negf %91 : vector<8x128xf32>
    %93 = math.exp %92 : vector<8x128xf32>
    %cst_29 = arith.constant 1.000000e+00 : f32
    %94 = vector.broadcast %cst_29 : f32 to vector<8x128xf32>
    %95 = arith.addf %94, %93 : vector<8x128xf32>
    %96 = arith.divf %94, %95 : vector<8x128xf32>
    %97 = arith.mulf %88, %68 : vector<8x128xf32>
    %98 = arith.mulf %82, %90 : vector<8x128xf32>
    %99 = arith.addf %97, %98 : vector<8x128xf32>
    %100 = math.tanh %99 : vector<8x128xf32>
    %101 = arith.mulf %96, %100 : vector<8x128xf32>
    %c2 = arith.constant 2 : index
    %c0_30 = arith.constant 0 : index
    %c0_31 = arith.constant 0 : index
    %102 = vector.load %arg5[%c2, %c0_30, %c0_31] : memref<8x8x128xf32, #tpu.memory_space<vmem>>, vector<1x8x128xf32>
    %103 = vector.shape_cast %102 : vector<1x8x128xf32> to vector<8x128xf32>
    %104 = vector.shape_cast %101 : vector<8x128xf32> to vector<1x8x128xf32>
    tpu.vector_store %arg5[%c2, %c0_30, %c0_31], %104 {strides = array<i32>} : memref<8x8x128xf32, #tpu.memory_space<vmem>>, vector<1x8x128xf32>,
    %c24 = arith.constant 24 : index
    %c0_32 = arith.constant 0 : index
    %105 = vector.load %arg7[%c24, %c0_32] : memref<64x512xf32, #tpu.memory_space<vmem>>, vector<8x512xf32>
    %cst_33 = arith.constant dense<0.000000e+00> : vector<8x512xf32>
    %106 = tpu.matmul %101, %9, %cst_33 {dimension_numbers = #tpu.dot_dimension_numbers<[1], [0], [0], [1], [0, 0, 1, 1], [], []>} : vector<8x128xf32>, vector<128x512xf32>, vector<8x512xf32> -> vector<8x512xf32>
    %107 = arith.addf %105, %106 : vector<8x512xf32>
    %108 = vector.extract_strided_slice %107 {offsets = [0, 0], sizes = [8, 128], strides = [1, 1]} : vector<8x512xf32> to vector<8x128xf32>
    %109 = arith.negf %108 : vector<8x128xf32>
    %110 = math.exp %109 : vector<8x128xf32>
    %cst_34 = arith.constant 1.000000e+00 : f32
    %111 = vector.broadcast %cst_34 : f32 to vector<8x128xf32>
    %112 = arith.addf %111, %110 : vector<8x128xf32>
    %113 = arith.divf %111, %112 : vector<8x128xf32>
    %114 = vector.extract_strided_slice %107 {offsets = [0, 128], sizes = [8, 128], strides = [1, 1]} : vector<8x512xf32> to vector<8x128xf32>
    %115 = arith.negf %114 : vector<8x128xf32>
    %116 = math.exp %115 : vector<8x128xf32>
    %cst_35 = arith.constant 1.000000e+00 : f32
    %117 = vector.broadcast %cst_35 : f32 to vector<8x128xf32>
    %118 = arith.addf %117, %116 : vector<8x128xf32>
    %119 = arith.divf %117, %118 : vector<8x128xf32>
    %120 = vector.extract_strided_slice %107 {offsets = [0, 256], sizes = [8, 128], strides = [1, 1]} : vector<8x512xf32> to vector<8x128xf32>
    %121 = math.tanh %120 : vector<8x128xf32>
    %122 = vector.extract_strided_slice %107 {offsets = [0, 384], sizes = [8, 128], strides = [1, 1]} : vector<8x512xf32> to vector<8x128xf32>
    %123 = arith.negf %122 : vector<8x128xf32>
    %124 = math.exp %123 : vector<8x128xf32>
    %cst_36 = arith.constant 1.000000e+00 : f32
    %125 = vector.broadcast %cst_36 : f32 to vector<8x128xf32>
    %126 = arith.addf %125, %124 : vector<8x128xf32>
    %127 = arith.divf %125, %126 : vector<8x128xf32>
    %128 = arith.mulf %119, %99 : vector<8x128xf32>
    %129 = arith.mulf %113, %121 : vector<8x128xf32>
    %130 = arith.addf %128, %129 : vector<8x128xf32>
    %131 = math.tanh %130 : vector<8x128xf32>
    %132 = arith.mulf %127, %131 : vector<8x128xf32>
    %c3 = arith.constant 3 : index
    %c0_37 = arith.constant 0 : index
    %c0_38 = arith.constant 0 : index
    %133 = vector.load %arg5[%c3, %c0_37, %c0_38] : memref<8x8x128xf32, #tpu.memory_space<vmem>>, vector<1x8x128xf32>
    %134 = vector.shape_cast %133 : vector<1x8x128xf32> to vector<8x128xf32>
    %135 = vector.shape_cast %132 : vector<8x128xf32> to vector<1x8x128xf32>
    tpu.vector_store %arg5[%c3, %c0_37, %c0_38], %135 {strides = array<i32>} : memref<8x8x128xf32, #tpu.memory_space<vmem>>, vector<1x8x128xf32>,
    %c32 = arith.constant 32 : index
    %c0_39 = arith.constant 0 : index
    %136 = vector.load %arg7[%c32, %c0_39] : memref<64x512xf32, #tpu.memory_space<vmem>>, vector<8x512xf32>
    %cst_40 = arith.constant dense<0.000000e+00> : vector<8x512xf32>
    %137 = tpu.matmul %132, %9, %cst_40 {dimension_numbers = #tpu.dot_dimension_numbers<[1], [0], [0], [1], [0, 0, 1, 1], [], []>} : vector<8x128xf32>, vector<128x512xf32>, vector<8x512xf32> -> vector<8x512xf32>
    %138 = arith.addf %136, %137 : vector<8x512xf32>
    %139 = vector.extract_strided_slice %138 {offsets = [0, 0], sizes = [8, 128], strides = [1, 1]} : vector<8x512xf32> to vector<8x128xf32>
    %140 = arith.negf %139 : vector<8x128xf32>
    %141 = math.exp %140 : vector<8x128xf32>
    %cst_41 = arith.constant 1.000000e+00 : f32
    %142 = vector.broadcast %cst_41 : f32 to vector<8x128xf32>
    %143 = arith.addf %142, %141 : vector<8x128xf32>
    %144 = arith.divf %142, %143 : vector<8x128xf32>
    %145 = vector.extract_strided_slice %138 {offsets = [0, 128], sizes = [8, 128], strides = [1, 1]} : vector<8x512xf32> to vector<8x128xf32>
    %146 = arith.negf %145 : vector<8x128xf32>
    %147 = math.exp %146 : vector<8x128xf32>
    %cst_42 = arith.constant 1.000000e+00 : f32
    %148 = vector.broadcast %cst_42 : f32 to vector<8x128xf32>
    %149 = arith.addf %148, %147 : vector<8x128xf32>
    %150 = arith.divf %148, %149 : vector<8x128xf32>
    %151 = vector.extract_strided_slice %138 {offsets = [0, 256], sizes = [8, 128], strides = [1, 1]} : vector<8x512xf32> to vector<8x128xf32>
    %152 = math.tanh %151 : vector<8x128xf32>
    %153 = vector.extract_strided_slice %138 {offsets = [0, 384], sizes = [8, 128], strides = [1, 1]} : vector<8x512xf32> to vector<8x128xf32>
    %154 = arith.negf %153 : vector<8x128xf32>
    %155 = math.exp %154 : vector<8x128xf32>
    %cst_43 = arith.constant 1.000000e+00 : f32
    %156 = vector.broadcast %cst_43 : f32 to vector<8x128xf32>
    %157 = arith.addf %156, %155 : vector<8x128xf32>
    %158 = arith.divf %156, %157 : vector<8x128xf32>
    %159 = arith.mulf %150, %130 : vector<8x128xf32>
    %160 = arith.mulf %144, %152 : vector<8x128xf32>
    %161 = arith.addf %159, %160 : vector<8x128xf32>
    %162 = math.tanh %161 : vector<8x128xf32>
    %163 = arith.mulf %158, %162 : vector<8x128xf32>
    %c4 = arith.constant 4 : index
    %c0_44 = arith.constant 0 : index
    %c0_45 = arith.constant 0 : index
    %164 = vector.load %arg5[%c4, %c0_44, %c0_45] : memref<8x8x128xf32, #tpu.memory_space<vmem>>, vector<1x8x128xf32>
    %165 = vector.shape_cast %164 : vector<1x8x128xf32> to vector<8x128xf32>
    %166 = vector.shape_cast %163 : vector<8x128xf32> to vector<1x8x128xf32>
    tpu.vector_store %arg5[%c4, %c0_44, %c0_45], %166 {strides = array<i32>} : memref<8x8x128xf32, #tpu.memory_space<vmem>>, vector<1x8x128xf32>,
    %c40 = arith.constant 40 : index
    %c0_46 = arith.constant 0 : index
    %167 = vector.load %arg7[%c40, %c0_46] : memref<64x512xf32, #tpu.memory_space<vmem>>, vector<8x512xf32>
    %cst_47 = arith.constant dense<0.000000e+00> : vector<8x512xf32>
    %168 = tpu.matmul %163, %9, %cst_47 {dimension_numbers = #tpu.dot_dimension_numbers<[1], [0], [0], [1], [0, 0, 1, 1], [], []>} : vector<8x128xf32>, vector<128x512xf32>, vector<8x512xf32> -> vector<8x512xf32>
    %169 = arith.addf %167, %168 : vector<8x512xf32>
    %170 = vector.extract_strided_slice %169 {offsets = [0, 0], sizes = [8, 128], strides = [1, 1]} : vector<8x512xf32> to vector<8x128xf32>
    %171 = arith.negf %170 : vector<8x128xf32>
    %172 = math.exp %171 : vector<8x128xf32>
    %cst_48 = arith.constant 1.000000e+00 : f32
    %173 = vector.broadcast %cst_48 : f32 to vector<8x128xf32>
    %174 = arith.addf %173, %172 : vector<8x128xf32>
    %175 = arith.divf %173, %174 : vector<8x128xf32>
    %176 = vector.extract_strided_slice %169 {offsets = [0, 128], sizes = [8, 128], strides = [1, 1]} : vector<8x512xf32> to vector<8x128xf32>
    %177 = arith.negf %176 : vector<8x128xf32>
    %178 = math.exp %177 : vector<8x128xf32>
    %cst_49 = arith.constant 1.000000e+00 : f32
    %179 = vector.broadcast %cst_49 : f32 to vector<8x128xf32>
    %180 = arith.addf %179, %178 : vector<8x128xf32>
    %181 = arith.divf %179, %180 : vector<8x128xf32>
    %182 = vector.extract_strided_slice %169 {offsets = [0, 256], sizes = [8, 128], strides = [1, 1]} : vector<8x512xf32> to vector<8x128xf32>
    %183 = math.tanh %182 : vector<8x128xf32>
    %184 = vector.extract_strided_slice %169 {offsets = [0, 384], sizes = [8, 128], strides = [1, 1]} : vector<8x512xf32> to vector<8x128xf32>
    %185 = arith.negf %184 : vector<8x128xf32>
    %186 = math.exp %185 : vector<8x128xf32>
    %cst_50 = arith.constant 1.000000e+00 : f32
    %187 = vector.broadcast %cst_50 : f32 to vector<8x128xf32>
    %188 = arith.addf %187, %186 : vector<8x128xf32>
    %189 = arith.divf %187, %188 : vector<8x128xf32>
    %190 = arith.mulf %181, %161 : vector<8x128xf32>
    %191 = arith.mulf %175, %183 : vector<8x128xf32>
    %192 = arith.addf %190, %191 : vector<8x128xf32>
    %193 = math.tanh %192 : vector<8x128xf32>
    %194 = arith.mulf %189, %193 : vector<8x128xf32>
    %c5 = arith.constant 5 : index
    %c0_51 = arith.constant 0 : index
    %c0_52 = arith.constant 0 : index
    %195 = vector.load %arg5[%c5, %c0_51, %c0_52] : memref<8x8x128xf32, #tpu.memory_space<vmem>>, vector<1x8x128xf32>
    %196 = vector.shape_cast %195 : vector<1x8x128xf32> to vector<8x128xf32>
    %197 = vector.shape_cast %194 : vector<8x128xf32> to vector<1x8x128xf32>
    tpu.vector_store %arg5[%c5, %c0_51, %c0_52], %197 {strides = array<i32>} : memref<8x8x128xf32, #tpu.memory_space<vmem>>, vector<1x8x128xf32>,
    %c48 = arith.constant 48 : index
    %c0_53 = arith.constant 0 : index
    %198 = vector.load %arg7[%c48, %c0_53] : memref<64x512xf32, #tpu.memory_space<vmem>>, vector<8x512xf32>
    %cst_54 = arith.constant dense<0.000000e+00> : vector<8x512xf32>
    %199 = tpu.matmul %194, %9, %cst_54 {dimension_numbers = #tpu.dot_dimension_numbers<[1], [0], [0], [1], [0, 0, 1, 1], [], []>} : vector<8x128xf32>, vector<128x512xf32>, vector<8x512xf32> -> vector<8x512xf32>
    %200 = arith.addf %198, %199 : vector<8x512xf32>
    %201 = vector.extract_strided_slice %200 {offsets = [0, 0], sizes = [8, 128], strides = [1, 1]} : vector<8x512xf32> to vector<8x128xf32>
    %202 = arith.negf %201 : vector<8x128xf32>
    %203 = math.exp %202 : vector<8x128xf32>
    %cst_55 = arith.constant 1.000000e+00 : f32
    %204 = vector.broadcast %cst_55 : f32 to vector<8x128xf32>
    %205 = arith.addf %204, %203 : vector<8x128xf32>
    %206 = arith.divf %204, %205 : vector<8x128xf32>
    %207 = vector.extract_strided_slice %200 {offsets = [0, 128], sizes = [8, 128], strides = [1, 1]} : vector<8x512xf32> to vector<8x128xf32>
    %208 = arith.negf %207 : vector<8x128xf32>
    %209 = math.exp %208 : vector<8x128xf32>
    %cst_56 = arith.constant 1.000000e+00 : f32
    %210 = vector.broadcast %cst_56 : f32 to vector<8x128xf32>
    %211 = arith.addf %210, %209 : vector<8x128xf32>
    %212 = arith.divf %210, %211 : vector<8x128xf32>
    %213 = vector.extract_strided_slice %200 {offsets = [0, 256], sizes = [8, 128], strides = [1, 1]} : vector<8x512xf32> to vector<8x128xf32>
    %214 = math.tanh %213 : vector<8x128xf32>
    %215 = vector.extract_strided_slice %200 {offsets = [0, 384], sizes = [8, 128], strides = [1, 1]} : vector<8x512xf32> to vector<8x128xf32>
    %216 = arith.negf %215 : vector<8x128xf32>
    %217 = math.exp %216 : vector<8x128xf32>
    %cst_57 = arith.constant 1.000000e+00 : f32
    %218 = vector.broadcast %cst_57 : f32 to vector<8x128xf32>
    %219 = arith.addf %218, %217 : vector<8x128xf32>
    %220 = arith.divf %218, %219 : vector<8x128xf32>
    %221 = arith.mulf %212, %192 : vector<8x128xf32>
    %222 = arith.mulf %206, %214 : vector<8x128xf32>
    %223 = arith.addf %221, %222 : vector<8x128xf32>
    %224 = math.tanh %223 : vector<8x128xf32>
    %225 = arith.mulf %220, %224 : vector<8x128xf32>
    %c6 = arith.constant 6 : index
    %c0_58 = arith.constant 0 : index
    %c0_59 = arith.constant 0 : index
    %226 = vector.load %arg5[%c6, %c0_58, %c0_59] : memref<8x8x128xf32, #tpu.memory_space<vmem>>, vector<1x8x128xf32>
    %227 = vector.shape_cast %226 : vector<1x8x128xf32> to vector<8x128xf32>
    %228 = vector.shape_cast %225 : vector<8x128xf32> to vector<1x8x128xf32>
    tpu.vector_store %arg5[%c6, %c0_58, %c0_59], %228 {strides = array<i32>} : memref<8x8x128xf32, #tpu.memory_space<vmem>>, vector<1x8x128xf32>,
    %c56 = arith.constant 56 : index
    %c0_60 = arith.constant 0 : index
    %229 = vector.load %arg7[%c56, %c0_60] : memref<64x512xf32, #tpu.memory_space<vmem>>, vector<8x512xf32>
    %cst_61 = arith.constant dense<0.000000e+00> : vector<8x512xf32>
    %230 = tpu.matmul %225, %9, %cst_61 {dimension_numbers = #tpu.dot_dimension_numbers<[1], [0], [0], [1], [0, 0, 1, 1], [], []>} : vector<8x128xf32>, vector<128x512xf32>, vector<8x512xf32> -> vector<8x512xf32>
    %231 = arith.addf %229, %230 : vector<8x512xf32>
    %232 = vector.extract_strided_slice %231 {offsets = [0, 0], sizes = [8, 128], strides = [1, 1]} : vector<8x512xf32> to vector<8x128xf32>
    %233 = arith.negf %232 : vector<8x128xf32>
    %234 = math.exp %233 : vector<8x128xf32>
    %cst_62 = arith.constant 1.000000e+00 : f32
    %235 = vector.broadcast %cst_62 : f32 to vector<8x128xf32>
    %236 = arith.addf %235, %234 : vector<8x128xf32>
    %237 = arith.divf %235, %236 : vector<8x128xf32>
    %238 = vector.extract_strided_slice %231 {offsets = [0, 128], sizes = [8, 128], strides = [1, 1]} : vector<8x512xf32> to vector<8x128xf32>
    %239 = arith.negf %238 : vector<8x128xf32>
    %240 = math.exp %239 : vector<8x128xf32>
    %cst_63 = arith.constant 1.000000e+00 : f32
    %241 = vector.broadcast %cst_63 : f32 to vector<8x128xf32>
    %242 = arith.addf %241, %240 : vector<8x128xf32>
    %243 = arith.divf %241, %242 : vector<8x128xf32>
    %244 = vector.extract_strided_slice %231 {offsets = [0, 256], sizes = [8, 128], strides = [1, 1]} : vector<8x512xf32> to vector<8x128xf32>
    %245 = math.tanh %244 : vector<8x128xf32>
    %246 = vector.extract_strided_slice %231 {offsets = [0, 384], sizes = [8, 128], strides = [1, 1]} : vector<8x512xf32> to vector<8x128xf32>
    %247 = arith.negf %246 : vector<8x128xf32>
    %248 = math.exp %247 : vector<8x128xf32>
    %cst_64 = arith.constant 1.000000e+00 : f32
    %249 = vector.broadcast %cst_64 : f32 to vector<8x128xf32>
    %250 = arith.addf %249, %248 : vector<8x128xf32>
    %251 = arith.divf %249, %250 : vector<8x128xf32>
    %252 = arith.mulf %243, %223 : vector<8x128xf32>
    %253 = arith.mulf %237, %245 : vector<8x128xf32>
    %254 = arith.addf %252, %253 : vector<8x128xf32>
    %255 = math.tanh %254 : vector<8x128xf32>
    %256 = arith.mulf %251, %255 : vector<8x128xf32>
    %c7 = arith.constant 7 : index
    %c0_65 = arith.constant 0 : index
    %c0_66 = arith.constant 0 : index
    %257 = vector.load %arg5[%c7, %c0_65, %c0_66] : memref<8x8x128xf32, #tpu.memory_space<vmem>>, vector<1x8x128xf32>
    %258 = vector.shape_cast %257 : vector<1x8x128xf32> to vector<8x128xf32>
    %259 = vector.shape_cast %256 : vector<8x128xf32> to vector<1x8x128xf32>
    tpu.vector_store %arg5[%c7, %c0_65, %c0_66], %259 {strides = array<i32>} : memref<8x8x128xf32, #tpu.memory_space<vmem>>, vector<1x8x128xf32>,
    %c0_67 = arith.constant 0 : index
    %c0_68 = arith.constant 0 : index
    %260 = vector.load %arg3[%c0_67, %c0_68] : memref<128x128xf32, #tpu.memory_space<vmem>>, vector<128x128xf32>
    %cst_69 = arith.constant dense<0.000000e+00> : vector<8x128xf32>
    %261 = tpu.matmul %256, %260, %cst_69 {dimension_numbers = #tpu.dot_dimension_numbers<[1], [0], [0], [1], [0, 0, 1, 1], [], []>} : vector<8x128xf32>, vector<128x128xf32>, vector<8x128xf32> -> vector<8x128xf32>
    %c0_70 = arith.constant 0 : index
    %c0_71 = arith.constant 0 : index
    %262 = vector.load %arg4[%c0_70, %c0_71] : memref<1x128xf32, #tpu.memory_space<vmem>>, vector<1x128xf32>
    %263 = vector.broadcast %262 : vector<1x128xf32> to vector<8x128xf32>
    %264 = arith.addf %261, %263 : vector<8x128xf32>
    %c0_72 = arith.constant 0 : index
    %c0_73 = arith.constant 0 : index
    %265 = vector.load %arg6[%c0_72, %c0_73] : memref<8x128xf32, #tpu.memory_space<vmem>>, vector<8x128xf32>
    tpu.vector_store %arg6[%c0_72, %c0_73], %264 {strides = array<i32>} : memref<8x128xf32, #tpu.memory_space<vmem>>, vector<8x128xf32>,
    return
  }
}

</mosaic_0001>

<bundles_post_ra>
// kernel: rnn_classifier_forward.1
= control target key start
LH: loop header
LB: loop body
LE: loop exit
PB: predicated region body
PF: predicated region fallthrough
CT: control target
= control target key end

     0   :  { %v2850_v0 = vmov 0   ;;  %v2851_v6 = vmov 0.0   ;;  %vm2854_vm8 = vmmov 0   ;;  %s3789_s0 = inlined_call_operand.vmem [shape: s32[64,1], index: 0, kind: input, shape index: {}]   ;;  %s3790_s1 = inlined_call_operand.vmem [shape: f32[128,512], index: 1, kind: input, shape index: {}]   ;;  %s3791_s2 = inlined_call_operand.vmem [shape: f32[128,512], index: 2, kind: input, shape index: {}]   ;;  %s3792_s5 = inlined_call_operand.vmem [shape: f32[8,8,128], index: 5, kind: output, shape index: {0}]   ;;  %s3793_s3 = inlined_call_operand.vmem [shape: f32[128,128], index: 3, kind: input, shape index: {}]   ;;  %s3794_s4 = inlined_call_operand.vmem [shape: f32[1,128], index: 4, kind: input, shape index: {}]   ;;  %s3795_s6 = inlined_call_operand.vmem [shape: f32[8,128], index: 6, kind: output, shape index: {1}]  }
   0x1   :  { %2721 = vset.pattern.permute.xlu1 %v2850_v0  ;;  %2720 = vset.pattern.permute.xlu0 %v2850_v0  ;;  %v24_v1 = vld [vmem:[%s3789_s0 + $0x10] sm:$0xff]  ;;  %v22_v2 = vld [vmem:[%s3789_s0] sm:$0xff]  ;;  %v25_v3 = vld [vmem:[%s3789_s0 + $0x18] sm:$0xff] }
   0x2   :  { %39 = vperm.xlu1 %2721, %v24_v1   ;;  %33 = vperm.xlu0 %2720, %v22_v2   ;;  %v23_v4 = vld [vmem:[%s3789_s0 + $0x8] sm:$0xff]  ;;  %v80_v8 = vld [vmem:[%s3790_s1] sm:$0xff]  ;;  %v83_v14 = vld [vmem:[%s3790_s1 + $0x18] sm:$0xff] }
   0x3   :  { %v81_v5 = vld [vmem:[%s3790_s1 + $0x8] sm:$0xff]  ;;  %208 = vmatprep.mubr.f32.mxu0 %v2851_v6  ;;  %321 = vmatprep.mubr.f32.mxu1 %v2851_v6  ;;  %v84_v9 = vld [vmem:[%s3790_s1 + $0x20] sm:$0xff]  ;;  %v87_v15 = vld [vmem:[%s3790_s1 + $0x38] sm:$0xff] }
   0x4   :  { %v85_v7 = vld [vmem:[%s3790_s1 + $0x28] sm:$0xff]  ;;  %v26_v11 = vld [vmem:[%s3789_s0 + $0x20] sm:$0xff]  ;;  %v2085_v13 = vpack.c.bf16 %v84_v9, %v80_v8  ;;  %v82_v16 = vld [vmem:[%s3790_s1 + $0x10] sm:$0xff]  ;;  %v2115_v17 = vpack.c.bf16 %v87_v15, %v83_v14 }
   0x5   :  { %v27_v10 = vld [vmem:[%s3789_s0 + $0x28] sm:$0xff]  ;;  %v2083_v12 = vpack.c.bf16 %v85_v7, %v81_v5  ;;  %v86_v18 = vld [vmem:[%s3790_s1 + $0x30] sm:$0xff]  ;;  %v88_v23 = vld [vmem:[%s3790_s1 + $0x40] sm:$0xff] }
   0x6   :  { %42 = vperm.xlu1 %2721, %v25_v3   ;;  %36 = vperm.xlu0 %2720, %v23_v4   ;;  %v89_v19 = vld [vmem:[%s3790_s1 + $0x48] sm:$0xff]  ;;  %v2117_v21 = vpack.c.bf16 %v86_v18, %v82_v16  ;;  %v92_v24 = vld [vmem:[%s3790_s1 + $0x60] sm:$0xff]  ;;  %v91_v25 = vld [vmem:[%s3790_s1 + $0x58] sm:$0xff] }
   0x7   :  { %v93_v20 = vld [vmem:[%s3790_s1 + $0x68] sm:$0xff]  ;;  %2084 = vmatprep.subr.bf16.mxu0 %v2083_v12  ;;  %2116 = vmatprep.subr.bf16.mxu1 %v2115_v17  ;;  %v2089_v26 = vpack.c.bf16 %v92_v24, %v88_v23  ;;  %v95_v27 = vld [vmem:[%s3790_s1 + $0x78] sm:$0xff]  ;;  %v90_v28 = vld [vmem:[%s3790_s1 + $0x50] sm:$0xff] }
   0x8   :  { %v2087_v22 = vpack.c.bf16 %v93_v20, %v89_v19  ;;  %2086 = vmatpush1.bf16.msra.mxu0 %v2085_v13  ;;  %v94_v29 = vld [vmem:[%s3790_s1 + $0x70] sm:$0xff]  ;;  %v29_v30 = vld [vmem:[%s3789_s0 + $0x38] sm:$0xff]  ;;  %2118 = vmatpush1.bf16.msra.mxu1 %v2117_v21  ;;  %v2119_v32 = vpack.c.bf16 %v95_v27, %v91_v25  ;;  %v97_v34 = vld [vmem:[%s3790_s1 + $0x88] sm:$0xff] }
   0x9   :  { %v28_v31 = vld [vmem:[%s3789_s0 + $0x30] sm:$0xff]  ;;  %v2121_v33 = vpack.c.bf16 %v94_v29, %v90_v28  ;;  %v101_v35 = vld [vmem:[%s3790_s1 + $0xa8] sm:$0xff]  ;;  %v96_v36 = vld [vmem:[%s3790_s1 + $0x80] sm:$0xff] }
   0xa   :  { %2088 = vmatprep.subr.bf16.mxu0 %v2087_v22  ;;  %48 = vperm.xlu1 %2721, %v27_v10   ;;  %v2091_v37 = vpack.c.bf16 %v101_v35, %v97_v34  ;;  %v100_v38 = vld [vmem:[%s3790_s1 + $0xa0] sm:$0xff]  ;;  %v99_v39 = vld [vmem:[%s3790_s1 + $0x98] sm:$0xff]  ;;  %v98_v42 = vld [vmem:[%s3790_s1 + $0x90] sm:$0xff] }
   0xb   :  { %45 = vperm.xlu0 %2720, %v26_v11   ;;  %v103_v40 = vld [vmem:[%s3790_s1 + $0xb8] sm:$0xff]  ;;  %2120 = vmatprep.subr.bf16.mxu1 %v2119_v32  ;;  %v102_v43 = vld [vmem:[%s3790_s1 + $0xb0] sm:$0xff]  ;;  %v105_v44 = vld [vmem:[%s3790_s1 + $0xc8] sm:$0xff]  ;;  %v2093_v45 = vpack.c.bf16 %v100_v38, %v96_v36 }
   0xc   :  { %v2123_v41 = vpack.c.bf16 %v103_v40, %v99_v39  ;;  %2090 = vmatpush1.bf16.msra.mxu0 %v2089_v26  ;;  %v109_v46 = vld [vmem:[%s3790_s1 + $0xe8] sm:$0xff]  ;;  %v104_v47 = vld [vmem:[%s3790_s1 + $0xc0] sm:$0xff]  ;;  %2122 = vmatpush1.bf16.msra.mxu1 %v2121_v33  ;;  %v2125_v49 = vpack.c.bf16 %v102_v43, %v98_v42  ;;  %v107_v51 = vld [vmem:[%s3790_s1 + $0xd8] sm:$0xff] }
   0xd   :  { %v108_v48 = vld [vmem:[%s3790_s1 + $0xe0] sm:$0xff]  ;;  %2092 = vmatprep.subr.bf16.mxu0 %v2091_v37  ;;  %v2095_v50 = vpack.c.bf16 %v109_v46, %v105_v44  ;;  %v111_v52 = vld [vmem:[%s3790_s1 + $0xf8] sm:$0xff]  ;;  %v106_v53 = vld [vmem:[%s3790_s1 + $0xd0] sm:$0xff] }
   0xe   :  { %54 = vperm.xlu1 %2721, %v29_v30   ;;  %v2127_v54 = vpack.c.bf16 %v111_v52, %v107_v51  ;;  %v110_v55 = vld [vmem:[%s3790_s1 + $0xf0] sm:$0xff]  ;;  %v113_v56 = vld [vmem:[%s3790_s1 + $0x108] sm:$0xff]  ;;  %2124 = vmatprep.subr.bf16.mxu1 %v2123_v41  ;;  %v115_v58 = vld [vmem:[%s3790_s1 + $0x118] sm:$0xff]  ;;  %v2097_v59 = vpack.c.bf16 %v108_v48, %v104_v47 }
   0xf   :  { %51 = vperm.xlu0 %2720, %v28_v31   ;;  %v117_v57 = vld [vmem:[%s3790_s1 + $0x128] sm:$0xff]  ;;  %v119_v60 = vld [vmem:[%s3790_s1 + $0x138] sm:$0xff]  ;;  %v2129_v61 = vpack.c.bf16 %v110_v55, %v106_v53  ;;  %v112_v63 = vld [vmem:[%s3790_s1 + $0x100] sm:$0xff] }
  0x10   :  { %2094 = vmatpush1.bf16.msra.mxu0 %v2093_v45  ;;  %2126 = vmatpush1.bf16.msra.mxu1 %v2125_v49  ;;  %v2099_v62 = vpack.c.bf16 %v117_v57, %v113_v56  ;;  %v116_v0 = vld [vmem:[%s3790_s1 + $0x120] sm:$0xff]  ;;  %v114_v1 = vld [vmem:[%s3790_s1 + $0x110] sm:$0xff]  ;;  %v2131_v2 = vpack.c.bf16 %v119_v60, %v115_v58  ;;  %v121_v4 = vld [vmem:[%s3790_s1 + $0x148] sm:$0xff]  ;;  %v30_v49 = vlaneseq }
  0x11   :  { %2096 = vmatprep.subr.bf16.mxu0 %v2095_v50  ;;  %2128 = vmatprep.subr.bf16.mxu1 %v2127_v54  ;;  %v118_v3 = vld [vmem:[%s3790_s1 + $0x130] sm:$0xff]  ;;  %v125_v5 = vld [vmem:[%s3790_s1 + $0x168] sm:$0xff]  ;;  %v123_v7 = vld [vmem:[%s3790_s1 + $0x158] sm:$0xff]  ;;  %v2101_v9 = vpack.c.bf16 %v116_v0, %v112_v63 }
  0x12   :  { %v127_v8 = vld [vmem:[%s3790_s1 + $0x178] sm:$0xff]  ;;  %v2133_v10 = vpack.c.bf16 %v118_v3, %v114_v1  ;;  %v2103_v11 = vpack.c.bf16 %v125_v5, %v121_v4  ;;  %v120_v12 = vld [vmem:[%s3790_s1 + $0x140] sm:$0xff]  ;;  %v122_v14 = vld [vmem:[%s3790_s1 + $0x150] sm:$0xff]  ;;  %v3138_v54 = vand.u32 127, %v30_v49  ;;  %v2852_v5 = vmov 1.0  }
  0x13   :  { %v124_v13 = vld [vmem:[%s3790_s1 + $0x160] sm:$0xff]  ;;  %v2135_v15 = vpack.c.bf16 %v127_v8, %v123_v7  ;;  %v126_v16 = vld [vmem:[%s3790_s1 + $0x170] sm:$0xff]  ;;  %v129_v17 = vld [vmem:[%s3790_s1 + $0x188] sm:$0xff] }
  0x14   :  { %2098 = vmatpush1.bf16.msra.mxu0 %v2097_v59  ;;  %2130 = vmatpush1.bf16.msra.mxu1 %v2129_v61  ;;  %v133_v18 = vld [vmem:[%s3790_s1 + $0x1a8] sm:$0xff]  ;;  %v131_v19 = vld [vmem:[%s3790_s1 + $0x198] sm:$0xff]  ;;  %v2105_v21 = vpack.c.bf16 %v124_v13, %v120_v12  ;;  %v2137_v22 = vpack.c.bf16 %v126_v16, %v122_v14  ;;  %v128_v24 = vld [vmem:[%s3790_s1 + $0x180] sm:$0xff] }
  0x15   :  { %2100 = vmatprep.subr.bf16.mxu0 %v2099_v62  ;;  %2132 = vmatprep.subr.bf16.mxu1 %v2131_v2  ;;  %v135_v20 = vld [vmem:[%s3790_s1 + $0x1b8] sm:$0xff]  ;;  %v2107_v23 = vpack.c.bf16 %v133_v18, %v129_v17  ;;  %v132_v25 = vld [vmem:[%s3790_s1 + $0x1a0] sm:$0xff]  ;;  %v130_v26 = vld [vmem:[%s3790_s1 + $0x190] sm:$0xff] }
  0x16   :  { %v2139_v27 = vpack.c.bf16 %v135_v20, %v131_v19  ;;  %v134_v28 = vld [vmem:[%s3790_s1 + $0x1b0] sm:$0xff]  ;;  %v137_v29 = vld [vmem:[%s3790_s1 + $0x1c8] sm:$0xff]  ;;  %v139_v31 = vld [vmem:[%s3790_s1 + $0x1d8] sm:$0xff]  ;;  %v2109_v33 = vpack.c.bf16 %v132_v25, %v128_v24 }
  0x17   :  { %v141_v30 = vld [vmem:[%s3790_s1 + $0x1e8] sm:$0xff]  ;;  %v143_v32 = vld [vmem:[%s3790_s1 + $0x1f8] sm:$0xff]  ;;  %v2141_v34 = vpack.c.bf16 %v134_v28, %v130_v26  ;;  %v136_v36 = vld [vmem:[%s3790_s1 + $0x1c0] sm:$0xff] }
  0x18   :  { %2102 = vmatpush1.bf16.msra.mxu0 %v2101_v9  ;;  %2134 = vmatpush1.bf16.msra.mxu1 %v2133_v10  ;;  %v2111_v35 = vpack.c.bf16 %v141_v30, %v137_v29  ;;  %v140_v37 = vld [vmem:[%s3790_s1 + $0x1e0] sm:$0xff]  ;;  %v138_v38 = vld [vmem:[%s3790_s1 + $0x1d0] sm:$0xff]  ;;  %v2143_v39 = vpack.c.bf16 %v143_v32, %v139_v31  ;;  %v403_v41 = vld [vmem:[%s3791_s2 + $0x8] sm:$0xff] }
  0x19   :  { %2104 = vmatprep.subr.bf16.mxu0 %v2103_v11  ;;  %2136 = vmatprep.subr.bf16.mxu1 %v2135_v15  ;;  %v142_v40 = vld [vmem:[%s3790_s1 + $0x1f0] sm:$0xff]  ;;  %v407_v42 = vld [vmem:[%s3791_s2 + $0x28] sm:$0xff]  ;;  %v405_v43 = vld [vmem:[%s3791_s2 + $0x18] sm:$0xff]  ;;  %v2113_v45 = vpack.c.bf16 %v140_v37, %v136_v36 }
  0x1a   :  { %v409_v44 = vld [vmem:[%s3791_s2 + $0x38] sm:$0xff]  ;;  %v2145_v46 = vpack.c.bf16 %v142_v40, %v138_v38  ;;  %v3120_v47 = vpack.c.bf16 %v407_v42, %v403_v41  ;;  %v402_v50 = vld [vmem:[%s3791_s2] sm:$0xff]  ;;  %v404_v52 = vld [vmem:[%s3791_s2 + $0x10] sm:$0xff] }
  0x1b   :  { %v3122_v48 = vpack.c.bf16 %v409_v44, %v405_v43  ;;  %v406_v51 = vld [vmem:[%s3791_s2 + $0x20] sm:$0xff]  ;;  %v408_v53 = vld [vmem:[%s3791_s2 + $0x30] sm:$0xff]  ;;  %v411_v55 = vld [vmem:[%s3791_s2 + $0x48] sm:$0xff] }
  0x1c   :  { %2106 = vmatpush1.bf16.msra.mxu0 %v2105_v21  ;;  %2138 = vmatpush1.bf16.msra.mxu1 %v2137_v22  ;;  %v415_v56 = vld [vmem:[%s3791_s2 + $0x68] sm:$0xff]  ;;  %v413_v57 = vld [vmem:[%s3791_s2 + $0x58] sm:$0xff]  ;;  %v3152_v59 = vpack.c.bf16 %v406_v51, %v402_v50  ;;  %v3154_v60 = vpack.c.bf16 %v408_v53, %v404_v52  ;;  %v410_v61 = vld [vmem:[%s3791_s2 + $0x40] sm:$0xff] }
  0x1d   :  { %2108 = vmatprep.subr.bf16.mxu0 %v2107_v23  ;;  %2140 = vmatprep.subr.bf16.mxu1 %v2139_v27  ;;  %v417_v58 = vld [vmem:[%s3791_s2 + $0x78] sm:$0xff]  ;;  %v414_v63 = vld [vmem:[%s3791_s2 + $0x60] sm:$0xff]  ;;  %v412_v0 = vld [vmem:[%s3791_s2 + $0x50] sm:$0xff]  ;;  %v3169_v2 = vpack.c.bf16 %v415_v56, %v411_v55 }
  0x1e   :  { %v416_v1 = vld [vmem:[%s3791_s2 + $0x70] sm:$0xff]  ;;  %v3171_v3 = vpack.c.bf16 %v417_v58, %v413_v57  ;;  %v419_v4 = vld [vmem:[%s3791_s2 + $0x88] sm:$0xff]  ;;  %v421_v8 = vld [vmem:[%s3791_s2 + $0x98] sm:$0xff]  ;;  %v3189_v10 = vpack.c.bf16 %v414_v63, %v410_v61 }
  0x1f   :  { %v423_v7 = vld [vmem:[%s3791_s2 + $0xa8] sm:$0xff]  ;;  %v425_v9 = vld [vmem:[%s3791_s2 + $0xb8] sm:$0xff]  ;;  %v3191_v11 = vpack.c.bf16 %v416_v1, %v412_v0  ;;  %v418_v12 = vld [vmem:[%s3791_s2 + $0x80] sm:$0xff] }
  0x20   :  { %2110 = vmatpush1.bf16.msra.mxu0 %v2109_v33  ;;  %2142 = vmatpush1.bf16.msra.mxu1 %v2141_v34  ;;  %v422_v14 = vld [vmem:[%s3791_s2 + $0xa0] sm:$0xff]  ;;  %v420_v15 = vld [vmem:[%s3791_s2 + $0x90] sm:$0xff]  ;;  %v3210_v17 = vpack.c.bf16 %v423_v7, %v419_v4  ;;  %v3212_v18 = vpack.c.bf16 %v425_v9, %v421_v8  ;;  %v427_v19 = vld [vmem:[%s3791_s2 + $0xc8] sm:$0xff] }
  0x21   :  { %2112 = vmatprep.subr.bf16.mxu0 %v2111_v35  ;;  %2144 = vmatprep.subr.bf16.mxu1 %v2143_v39  ;;  %v424_v16 = vld [vmem:[%s3791_s2 + $0xb0] sm:$0xff]  ;;  %v431_v21 = vld [vmem:[%s3791_s2 + $0xe8] sm:$0xff]  ;;  %v429_v22 = vld [vmem:[%s3791_s2 + $0xd8] sm:$0xff]  ;;  %v3231_v24 = vpack.c.bf16 %v422_v14, %v418_v12 }
  0x22   :  { %v433_v23 = vld [vmem:[%s3791_s2 + $0xf8] sm:$0xff]  ;;  %v3233_v25 = vpack.c.bf16 %v424_v16, %v420_v15  ;;  %v426_v26 = vld [vmem:[%s3791_s2 + $0xc0] sm:$0xff]  ;;  %v428_v28 = vld [vmem:[%s3791_s2 + $0xd0] sm:$0xff]  ;;  %v3251_v30 = vpack.c.bf16 %v431_v21, %v427_v19 }
  0x23   :  { %v430_v27 = vld [vmem:[%s3791_s2 + $0xe0] sm:$0xff]  ;;  %v432_v29 = vld [vmem:[%s3791_s2 + $0xf0] sm:$0xff]  ;;  %v3253_v31 = vpack.c.bf16 %v433_v23, %v429_v22  ;;  %v435_v32 = vld [vmem:[%s3791_s2 + $0x108] sm:$0xff] }
  0x24   :  { %2114 = vmatpush1.bf16.msra.mxu0 %v2113_v45  ;;  %2146 = vmatpush1.bf16.msra.mxu1 %v2145_v46  ;;  %v439_v33 = vld [vmem:[%s3791_s2 + $0x128] sm:$0xff]  ;;  %v437_v34 = vld [vmem:[%s3791_s2 + $0x118] sm:$0xff]  ;;  %v3275_v36 = vpack.c.bf16 %v430_v27, %v426_v26  ;;  %v3277_v37 = vpack.c.bf16 %v432_v29, %v428_v28  ;;  %v434_v38 = vld [vmem:[%s3791_s2 + $0x100] sm:$0xff] }
  0x25   :  { %2148 = vmatprep.subr.bf16.mxu0 %v3120_v47  ;;  %2180 = vmatprep.subr.bf16.mxu1 %v3122_v48  ;;  %v441_v35 = vld [vmem:[%s3791_s2 + $0x138] sm:$0xff]  ;;  %v438_v40 = vld [vmem:[%s3791_s2 + $0x120] sm:$0xff]  ;;  %v436_v41 = vld [vmem:[%s3791_s2 + $0x110] sm:$0xff]  ;;  %v3296_v43 = vpack.c.bf16 %v439_v33, %v435_v32 }
  0x26   :  { %v440_v42 = vld [vmem:[%s3791_s2 + $0x130] sm:$0xff]  ;;  %v3298_v44 = vpack.c.bf16 %v441_v35, %v437_v34  ;;  %v443_v45 = vld [vmem:[%s3791_s2 + $0x148] sm:$0xff]  ;;  %v445_v50 = vld [vmem:[%s3791_s2 + $0x158] sm:$0xff]  ;;  %v3316_v52 = vpack.c.bf16 %v438_v40, %v434_v38 }
  0x27   :  { %v447_v49 = vld [vmem:[%s3791_s2 + $0x168] sm:$0xff]  ;;  %v449_v51 = vld [vmem:[%s3791_s2 + $0x178] sm:$0xff]  ;;  %v3318_v53 = vpack.c.bf16 %v440_v42, %v436_v41  ;;  %v442_v55 = vld [vmem:[%s3791_s2 + $0x140] sm:$0xff] }
  0x28   :  { %v446_v56 = vld [vmem:[%s3791_s2 + $0x160] sm:$0xff]  ;;  %v444_v57 = vld [vmem:[%s3791_s2 + $0x150] sm:$0xff]  ;;  %v3337_v61 = vpack.c.bf16 %v447_v49, %v443_v45  ;;  %v451_v63 = vld [vmem:[%s3791_s2 + $0x188] sm:$0xff] }
  0x29   :  { %v448_v58 = vld [vmem:[%s3791_s2 + $0x170] sm:$0xff]  ;;  %v455_v1 = vld [vmem:[%s3791_s2 + $0x1a8] sm:$0xff]  ;;  %v453_v4 = vld [vmem:[%s3791_s2 + $0x198] sm:$0xff]  ;;  %v3357_v8 = vpack.c.bf16 %v446_v56, %v442_v55 }
  0x2a   :  { %v457_v7 = vld [vmem:[%s3791_s2 + $0x1b8] sm:$0xff]  ;;  %v3359_v9 = vpack.c.bf16 %v448_v58, %v444_v57  ;;  %v450_v12 = vld [vmem:[%s3791_s2 + $0x180] sm:$0xff]  ;;  %v452_v14 = vld [vmem:[%s3791_s2 + $0x190] sm:$0xff]  ;;  %v3378_v16 = vpack.c.bf16 %v455_v1, %v451_v63 }
  0x2b   :  { %v456_v15 = vld [vmem:[%s3791_s2 + $0x1b0] sm:$0xff]  ;;  %v3380_v19 = vpack.c.bf16 %v457_v7, %v453_v4  ;;  %v463_v22 = vld [vmem:[%s3791_s2 + $0x1e8] sm:$0xff]  ;;  %v461_v23 = vld [vmem:[%s3791_s2 + $0x1d8] sm:$0xff] }
  0x2c   :  { %v465_v26 = vld [vmem:[%s3791_s2 + $0x1f8] sm:$0xff]  ;;  %v3400_v28 = vpack.c.bf16 %v456_v15, %v452_v14  ;;  %v458_v29 = vld [vmem:[%s3791_s2 + $0x1c0] sm:$0xff]  ;;  %v460_v33 = vld [vmem:[%s3791_s2 + $0x1d0] sm:$0xff] }
  0x2d   :  { %v462_v32 = vld [vmem:[%s3791_s2 + $0x1e0] sm:$0xff]  ;;  %v464_v34 = vld [vmem:[%s3791_s2 + $0x1f0] sm:$0xff]  ;;  %v3421_v38 = vpack.c.bf16 %v465_v26, %v461_v23 }
  0x2e   :  { %v3427_v40 = vpack.c.bf16 %v462_v32, %v458_v29  ;;  %v3429_v41 = vpack.c.bf16 %v464_v34, %v460_v33 }
  0x81   :  { %v34_v62 = vpop.permute.xlu0 %33  ;;  %v40_v20 = vpop.permute.xlu1 %39 }
  0x82   :  { %vm56_vm0 = vcmp.eq.s32.totalorder %v34_v62, %v3138_v54  ;;  %vm58_vm2 = vcmp.eq.s32.totalorder %v40_v20, %v3138_v54  ;;  %v3339_v62 = vpack.c.bf16 %v449_v51, %v445_v50  ;;  %v459_v20 = vld [vmem:[%s3791_s2 + $0x1c8] sm:$0xff] }
  0x83   :  { %1983 = vmatmul.mubr.msk.f32.vlgmr.msra.gmra.mrb[0].mxu0 %vm56_vm0, %v2852_v5  ;;  %1991 = vmatmul.mubr.msk.f32.vlgmr.msra.gmra.mrb[0].mxu1 %vm56_vm0, %v2852_v5  ;;  %v3419_v35 = vpack.c.bf16 %v463_v22, %v459_v20 }
  0x84   :  { %2150 = vmatpush1.bf16.msra.mxu0 %v3152_v59  ;;  %2182 = vmatpush1.bf16.msra.mxu1 %v3154_v60 }
  0x85   :  { %v37_v13 = vpop.permute.xlu0 %36  ;;  %214 = vmatprep.mubr.f32.mxu0 %v2851_v6  ;;  %327 = vmatprep.mubr.f32.mxu1 %v2851_v6  ;;  %v43_v39 = vpop.permute.xlu1 %42 }
  0x86   :  { %vm57_vm1 = vcmp.eq.s32.totalorder %v37_v13, %v3138_v54  ;;  %2152 = vmatprep.subr.bf16.mxu0 %v3169_v2  ;;  %2184 = vmatprep.subr.bf16.mxu1 %v3171_v3  ;;  %vm59_vm3 = vcmp.eq.s32.totalorder %v43_v39, %v3138_v54  ;;  %v454_v13 = vld [vmem:[%s3791_s2 + $0x1a0] sm:$0xff] }
  0x87   :  { %1984 = vmatmul.mubr.msk.f32.gmra.mrb[2].mxu0 %vm57_vm1, %v2852_v5  ;;  %1992 = vmatmul.mubr.msk.f32.gmra.mrb[2].mxu1 %vm57_vm1, %v2852_v5  ;;  %v3398_v27 = vpack.c.bf16 %v454_v13, %v450_v12 }
  0x88   :  { %2154 = vmatpush1.bf16.msra.mxu0 %v3189_v10  ;;  %2186 = vmatpush1.bf16.msra.mxu1 %v3191_v11 }
  0x89   :  { %220 = vmatprep.mubr.f32.mxu0 %v2851_v6  ;;  %333 = vmatprep.mubr.f32.mxu1 %v2851_v6  ;;  %v49_v0 = vpop.permute.xlu1 %48 }
  0x8a   :  { %2156 = vmatprep.subr.bf16.mxu0 %v3210_v17  ;;  %2188 = vmatprep.subr.bf16.mxu1 %v3212_v18  ;;  %v46_v46 = vpop.permute.xlu0 %45  ;;  %vm61_vm5 = vcmp.eq.s32.totalorder %v49_v0, %v3138_v54 }
  0x8b   :  { %1985 = vmatmul.mubr.msk.f32.gmra.mrb[4].mxu0 %vm58_vm2, %v2852_v5  ;;  %1993 = vmatmul.mubr.msk.f32.gmra.mrb[4].mxu1 %vm58_vm2, %v2852_v5  ;;  %vm60_vm4 = vcmp.eq.s32.totalorder %v46_v46, %v3138_v54 }
  0x8c   :  { %2158 = vmatpush1.bf16.msra.mxu0 %v3231_v24  ;;  %2190 = vmatpush1.bf16.msra.mxu1 %v3233_v25 }
  0x8d   :  { %226 = vmatprep.mubr.f32.mxu0 %v2851_v6  ;;  %339 = vmatprep.mubr.f32.mxu1 %v2851_v6  ;;  %v55_v39 = vpop.permute.xlu1 %54 }
  0x8e   :  { %2160 = vmatprep.subr.bf16.mxu0 %v3251_v30  ;;  %2192 = vmatprep.subr.bf16.mxu1 %v3253_v31  ;;  %v52_v21 = vpop.permute.xlu0 %51  ;;  %vm63_vm7 = vcmp.eq.s32.totalorder %v55_v39, %v3138_v54 }
  0x8f   :  { %1986 = vmatmul.mubr.msk.f32.gmra.mrb[6].mxu0 %vm59_vm3, %v2852_v5  ;;  %1994 = vmatmul.mubr.msk.f32.gmra.mrb[6].mxu1 %vm59_vm3, %v2852_v5  ;;  %vm62_vm6 = vcmp.eq.s32.totalorder %v52_v21, %v3138_v54 }
  0x90   :  { %2162 = vmatpush1.bf16.msra.mxu0 %v3275_v36  ;;  %2194 = vmatpush1.bf16.msra.mxu1 %v3277_v37 }
  0x91   :  { %232 = vmatprep.mubr.f32.mxu0 %v2851_v6  ;;  %345 = vmatprep.mubr.f32.mxu1 %v2851_v6 }
  0x92   :  { %2164 = vmatprep.subr.bf16.mxu0 %v3296_v43  ;;  %2196 = vmatprep.subr.bf16.mxu1 %v3298_v44 }
  0x93   :  { %1987 = vmatmul.mubr.msk.f32.gmra.mrb[8].mxu0 %vm60_vm4, %v2852_v5  ;;  %1995 = vmatmul.mubr.msk.f32.gmra.mrb[8].mxu1 %vm60_vm4, %v2852_v5 }
  0x94   :  { %2166 = vmatpush1.bf16.msra.mxu0 %v3316_v52  ;;  %2198 = vmatpush1.bf16.msra.mxu1 %v3318_v53 }
  0x95   :  { %238 = vmatprep.mubr.f32.mxu0 %v2851_v6  ;;  %351 = vmatprep.mubr.f32.mxu1 %v2851_v6 }
  0x96   :  { %2168 = vmatprep.subr.bf16.mxu0 %v3337_v61  ;;  %2200 = vmatprep.subr.bf16.mxu1 %v3339_v62 }
  0x97   :  { %1988 = vmatmul.mubr.msk.f32.gmra.mrb[10].mxu0 %vm61_vm5, %v2852_v5  ;;  %1996 = vmatmul.mubr.msk.f32.gmra.mrb[10].mxu1 %vm61_vm5, %v2852_v5 }
  0x98   :  { %2170 = vmatpush1.bf16.msra.mxu0 %v3357_v8  ;;  %2202 = vmatpush1.bf16.msra.mxu1 %v3359_v9 }
  0x99   :  { %244 = vmatprep.mubr.f32.mxu0 %v2851_v6  ;;  %357 = vmatprep.mubr.f32.mxu1 %v2851_v6 }
  0x9a   :  { %2172 = vmatprep.subr.bf16.mxu0 %v3378_v16  ;;  %2204 = vmatprep.subr.bf16.mxu1 %v3380_v19 }
  0x9b   :  { %1989 = vmatmul.mubr.msk.f32.gmra.mrb[12].mxu0 %vm62_vm6, %v2852_v5  ;;  %1997 = vmatmul.mubr.msk.f32.gmra.mrb[12].mxu1 %vm62_vm6, %v2852_v5 }
  0x9c   :  { %2174 = vmatpush1.bf16.msra.mxu0 %v3398_v27  ;;  %2206 = vmatpush1.bf16.msra.mxu1 %v3400_v28 }
  0x9d   :  { %250 = vmatprep.mubr.f32.mxu0 %v2851_v6  ;;  %363 = vmatprep.mubr.f32.mxu1 %v2851_v6 }
  0x9e   :  { %2176 = vmatprep.subr.bf16.mxu0 %v3419_v35  ;;  %2208 = vmatprep.subr.bf16.mxu1 %v3421_v38 }
  0x9f   :  { %1990 = vmatmul.mubr.msk.f32.gmra.mrb[14].mxu0 %vm63_vm7, %v2852_v5  ;;  %1998 = vmatmul.mubr.msk.f32.gmra.mrb[14].mxu1 %vm63_vm7, %v2852_v5 }
  0xa0   :  { %2178 = vmatpush1.bf16.msra.mxu0 %v3427_v40  ;;  %2210 = vmatpush1.bf16.msra.mxu1 %v3429_v41 }
  0xa1   :  { %534 = vmatprep.mubr.f32.mxu0 %v2851_v6  ;;  %605 = vmatprep.mubr.f32.mxu1 %v2851_v6 }
  0xa2   :  { %2212 = vmatprep.subr.bf16.mxu0 %v3120_v47  ;;  %2244 = vmatprep.subr.bf16.mxu1 %v3122_v48 }
  0xa3   :  { %535 = vmatmul.mubr.f32.vlgmr.msra.gmra.mrb[0].mxu0 %v2851_v6  ;;  %606 = vmatmul.mubr.f32.vlgmr.msra.gmra.mrb[0].mxu1 %v2851_v6 }
  0xa4   :  { %2214 = vmatpush1.bf16.msra.mxu0 %v3152_v59  ;;  %2246 = vmatpush1.bf16.msra.mxu1 %v3154_v60 }
  0xa5   :  { %2216 = vmatprep.subr.bf16.mxu0 %v3169_v2  ;;  %2248 = vmatprep.subr.bf16.mxu1 %v3171_v3 }
  0xa6   :  { %709 = vmatprep.mubr.f32.mxu0 %v2851_v6  ;;  %780 = vmatprep.mubr.f32.mxu1 %v2851_v6 }
  0xa8   :  { %2218 = vmatpush1.bf16.msra.mxu0 %v3189_v10  ;;  %2250 = vmatpush1.bf16.msra.mxu1 %v3191_v11 }
  0xa9   :  { %2220 = vmatprep.subr.bf16.mxu0 %v3210_v17  ;;  %2252 = vmatprep.subr.bf16.mxu1 %v3212_v18 }
  0xac   :  { %2222 = vmatpush1.bf16.msra.mxu0 %v3231_v24  ;;  %2254 = vmatpush1.bf16.msra.mxu1 %v3233_v25 }
  0xad   :  { %2224 = vmatprep.subr.bf16.mxu0 %v3251_v30  ;;  %2256 = vmatprep.subr.bf16.mxu1 %v3253_v31 }
  0xb0   :  { %2226 = vmatpush1.bf16.msra.mxu0 %v3275_v36  ;;  %2258 = vmatpush1.bf16.msra.mxu1 %v3277_v37 }
  0xb1   :  { %2228 = vmatprep.subr.bf16.mxu0 %v3296_v43  ;;  %2260 = vmatprep.subr.bf16.mxu1 %v3298_v44 }
  0xb4   :  { %2230 = vmatpush1.bf16.msra.mxu0 %v3316_v52  ;;  %2262 = vmatpush1.bf16.msra.mxu1 %v3318_v53 }
  0xb5   :  { %2232 = vmatprep.subr.bf16.mxu0 %v3337_v61  ;;  %2264 = vmatprep.subr.bf16.mxu1 %v3339_v62 }
  0xb8   :  { %2234 = vmatpush1.bf16.msra.mxu0 %v3357_v8  ;;  %2266 = vmatpush1.bf16.msra.mxu1 %v3359_v9 }
  0xb9   :  { %2236 = vmatprep.subr.bf16.mxu0 %v3378_v16  ;;  %2268 = vmatprep.subr.bf16.mxu1 %v3380_v19 }
  0xbc   :  { %2238 = vmatpush1.bf16.msra.mxu0 %v3398_v27  ;;  %2270 = vmatpush1.bf16.msra.mxu1 %v3400_v28 }
  0xbd   :  { %2240 = vmatprep.subr.bf16.mxu0 %v3419_v35  ;;  %2272 = vmatprep.subr.bf16.mxu1 %v3421_v38 }
  0xc0   :  { %2242 = vmatpush1.bf16.msra.mxu0 %v3427_v40  ;;  %2274 = vmatpush1.bf16.msra.mxu1 %v3429_v41 }
  0xc1   :  { %2276 = vmatprep.subr.bf16.mxu0 %v3120_v47  ;;  %2308 = vmatprep.subr.bf16.mxu1 %v3122_v48 }
 0x176   :  { %v536_v54 = vpop.f32.mrb[0].mxu0  ;;  %v607_v5 = vpop.f32.mrb[0].mxu1 }
 0x177   :  { %v1999_v42 = vmul.f32 -1.442695, %v536_v54  ;;  %v538_v45 = vpop.f32.mrb[1].mxu0  ;;  %v609_v46 = vpop.f32.mrb[1].mxu1 }
 0x178   :  { %v2000_v49 = vmul.f32 -1.442695, %v538_v45  ;;  %v2001_v50 = vmul.f32 -1.442695, %v609_v46 }
 0x179   :  { %2722 = vpow2.f32 %v1999_v42 }
 0x17a   :  { %2724 = vpow2.f32 %v2000_v49 }
 0x17b   :  { %2726 = vpow2.f32 %v2001_v50 }
 0x17c   :  { %2728 = vtanh.f32 %v607_v5 }
 0x183   :  { %v2723_v51 = vpop.eup %2722 }
 0x184   :  { %v2725_v55 = vpop.eup %2724  ;;  %v619_v56 = vadd.f32 1.0, %v2723_v51 }
 0x185   :  { %v625_v57 = vadd.f32 1.0, %v2725_v55  ;;  %v2727_v58 = vpop.eup %2726 }
 0x186   :  { %2730 = vrcp.f32 %v619_v56  ;;  %v2729_v63 = vpop.eup %2728  ;;  %v632_v7 = vadd.f32 1.0, %v2727_v58 }
 0x187   :  { %2732 = vrcp.f32 %v625_v57 }
 0x188   :  { %2734 = vrcp.f32 %v632_v7 }
 0x190   :  { %v2731_v0 = vpop.eup %2730 }
 0x191   :  { %v2733_v1 = vpop.eup %2732  ;;  %v636_v4 = vmul.f32 %v2731_v0, %v2729_v63 }
 0x192   :  { %v635_v12 = vmul.f32 0.0, %v2733_v1  ;;  %v2735_v14 = vpop.eup %2734 }
 0x194   :  { %v3480_v13 = vadd.f32 %v636_v4, %v635_v12 }
 0x196   :  { %2736 = vtanh.f32 %v3480_v13 }
 0x1a0   :  { %v2737_v15 = vpop.eup %2736 }
 0x1a1   :  { %v639_v20 = vmul.f32 %v2737_v15, %v2735_v14 }
 0x1a3   :  { %640 = vst [vmem:[%s3792_s5] sm:$0xff] %v639_v20  ;;  %710 = vmatmul.mubr.f32.vlgmr.msra.gmra.mrb[2].mxu0 %v639_v20  ;;  %781 = vmatmul.mubr.f32.vlgmr.msra.gmra.mrb[2].mxu1 %v639_v20 }
 0x1a4   :  { %2278 = vmatpush1.bf16.msra.mxu0 %v3152_v59  ;;  %2310 = vmatpush1.bf16.msra.mxu1 %v3154_v60 }
 0x1a5   :  { %2280 = vmatprep.subr.bf16.mxu0 %v3169_v2  ;;  %2312 = vmatprep.subr.bf16.mxu1 %v3171_v3 }
 0x1a6   :  { %885 = vmatprep.mubr.f32.mxu0 %v2851_v6  ;;  %956 = vmatprep.mubr.f32.mxu1 %v2851_v6 }
 0x1a8   :  { %2282 = vmatpush1.bf16.msra.mxu0 %v3189_v10  ;;  %2314 = vmatpush1.bf16.msra.mxu1 %v3191_v11 }
 0x1a9   :  { %2284 = vmatprep.subr.bf16.mxu0 %v3210_v17  ;;  %2316 = vmatprep.subr.bf16.mxu1 %v3212_v18 }
 0x1ac   :  { %2286 = vmatpush1.bf16.msra.mxu0 %v3231_v24  ;;  %2318 = vmatpush1.bf16.msra.mxu1 %v3233_v25 }
 0x1ad   :  { %2288 = vmatprep.subr.bf16.mxu0 %v3251_v30  ;;  %2320 = vmatprep.subr.bf16.mxu1 %v3253_v31 }
 0x1b0   :  { %2290 = vmatpush1.bf16.msra.mxu0 %v3275_v36  ;;  %2322 = vmatpush1.bf16.msra.mxu1 %v3277_v37 }
 0x1b1   :  { %2292 = vmatprep.subr.bf16.mxu0 %v3296_v43  ;;  %2324 = vmatprep.subr.bf16.mxu1 %v3298_v44 }
 0x1b4   :  { %2294 = vmatpush1.bf16.msra.mxu0 %v3316_v52  ;;  %2326 = vmatpush1.bf16.msra.mxu1 %v3318_v53 }
 0x1b5   :  { %2296 = vmatprep.subr.bf16.mxu0 %v3337_v61  ;;  %2328 = vmatprep.subr.bf16.mxu1 %v3339_v62 }
 0x1b8   :  { %2298 = vmatpush1.bf16.msra.mxu0 %v3357_v8  ;;  %2330 = vmatpush1.bf16.msra.mxu1 %v3359_v9 }
 0x1b9   :  { %2300 = vmatprep.subr.bf16.mxu0 %v3378_v16  ;;  %2332 = vmatprep.subr.bf16.mxu1 %v3380_v19 }
 0x1bc   :  { %2302 = vmatpush1.bf16.msra.mxu0 %v3398_v27  ;;  %2334 = vmatpush1.bf16.msra.mxu1 %v3400_v28 }
 0x1bd   :  { %2304 = vmatprep.subr.bf16.mxu0 %v3419_v35  ;;  %2336 = vmatprep.subr.bf16.mxu1 %v3421_v38 }
 0x1c0   :  { %2306 = vmatpush1.bf16.msra.mxu0 %v3427_v40  ;;  %2338 = vmatpush1.bf16.msra.mxu1 %v3429_v41 }
 0x1c1   :  { %2340 = vmatprep.subr.bf16.mxu0 %v3120_v47  ;;  %2372 = vmatprep.subr.bf16.mxu1 %v3122_v48 }
 0x276   :  { %v711_v21 = vpop.f32.mrb[2].mxu0  ;;  %v782_v22 = vpop.f32.mrb[2].mxu1 }
 0x277   :  { %v2002_v23 = vmul.f32 -1.442695, %v711_v21  ;;  %v713_v26 = vpop.f32.mrb[3].mxu0  ;;  %v784_v29 = vpop.f32.mrb[3].mxu1 }
 0x278   :  { %v2003_v32 = vmul.f32 -1.442695, %v713_v26  ;;  %v2004_v33 = vmul.f32 -1.442695, %v784_v29 }
 0x279   :  { %2738 = vpow2.f32 %v2002_v23 }
 0x27a   :  { %2740 = vpow2.f32 %v2003_v32 }
 0x27b   :  { %2742 = vpow2.f32 %v2004_v33 }
 0x27c   :  { %2744 = vtanh.f32 %v782_v22 }
 0x283   :  { %v2739_v34 = vpop.eup %2738 }
 0x284   :  { %v2741_v39 = vpop.eup %2740  ;;  %v794_v54 = vadd.f32 1.0, %v2739_v34 }
 0x285   :  { %v800_v5 = vadd.f32 1.0, %v2741_v39  ;;  %v2743_v42 = vpop.eup %2742 }
 0x286   :  { %2746 = vrcp.f32 %v794_v54  ;;  %v2745_v45 = vpop.eup %2744  ;;  %v807_v51 = vadd.f32 1.0, %v2743_v42 }
 0x287   :  { %2748 = vrcp.f32 %v800_v5 }
 0x288   :  { %2750 = vrcp.f32 %v807_v51 }
 0x290   :  { %v2747_v46 = vpop.eup %2746 }
 0x291   :  { %v2749_v49 = vpop.eup %2748  ;;  %v811_v50 = vmul.f32 %v2747_v46, %v2745_v45 }
 0x292   :  { %v810_v55 = vmul.f32 %v2749_v49, %v3480_v13  ;;  %v2751_v57 = vpop.eup %2750 }
 0x294   :  { %v3521_v56 = vadd.f32 %v811_v50, %v810_v55 }
 0x296   :  { %2752 = vtanh.f32 %v3521_v56 }
 0x2a0   :  { %v2753_v58 = vpop.eup %2752 }
 0x2a1   :  { %v814_v63 = vmul.f32 %v2753_v58, %v2751_v57 }
 0x2a3   :  { %2005 = vst [vmem:[%s3792_s5 + $0x8] sm:$0xff] %v814_v63  ;;  %886 = vmatmul.mubr.f32.vlgmr.msra.gmra.mrb[4].mxu0 %v814_v63  ;;  %957 = vmatmul.mubr.f32.vlgmr.msra.gmra.mrb[4].mxu1 %v814_v63 }
 0x2a4   :  { %2342 = vmatpush1.bf16.msra.mxu0 %v3152_v59  ;;  %2374 = vmatpush1.bf16.msra.mxu1 %v3154_v60 }
 0x2a5   :  { %2344 = vmatprep.subr.bf16.mxu0 %v3169_v2  ;;  %2376 = vmatprep.subr.bf16.mxu1 %v3171_v3 }
 0x2a6   :  { %1061 = vmatprep.mubr.f32.mxu0 %v2851_v6  ;;  %1132 = vmatprep.mubr.f32.mxu1 %v2851_v6 }
 0x2a8   :  { %2346 = vmatpush1.bf16.msra.mxu0 %v3189_v10  ;;  %2378 = vmatpush1.bf16.msra.mxu1 %v3191_v11 }
 0x2a9   :  { %2348 = vmatprep.subr.bf16.mxu0 %v3210_v17  ;;  %2380 = vmatprep.subr.bf16.mxu1 %v3212_v18 }
 0x2ac   :  { %2350 = vmatpush1.bf16.msra.mxu0 %v3231_v24  ;;  %2382 = vmatpush1.bf16.msra.mxu1 %v3233_v25 }
 0x2ad   :  { %2352 = vmatprep.subr.bf16.mxu0 %v3251_v30  ;;  %2384 = vmatprep.subr.bf16.mxu1 %v3253_v31 }
 0x2b0   :  { %2354 = vmatpush1.bf16.msra.mxu0 %v3275_v36  ;;  %2386 = vmatpush1.bf16.msra.mxu1 %v3277_v37 }
 0x2b1   :  { %2356 = vmatprep.subr.bf16.mxu0 %v3296_v43  ;;  %2388 = vmatprep.subr.bf16.mxu1 %v3298_v44 }
 0x2b4   :  { %2358 = vmatpush1.bf16.msra.mxu0 %v3316_v52  ;;  %2390 = vmatpush1.bf16.msra.mxu1 %v3318_v53 }
 0x2b5   :  { %2360 = vmatprep.subr.bf16.mxu0 %v3337_v61  ;;  %2392 = vmatprep.subr.bf16.mxu1 %v3339_v62 }
 0x2b8   :  { %2362 = vmatpush1.bf16.msra.mxu0 %v3357_v8  ;;  %2394 = vmatpush1.bf16.msra.mxu1 %v3359_v9 }
 0x2b9   :  { %2364 = vmatprep.subr.bf16.mxu0 %v3378_v16  ;;  %2396 = vmatprep.subr.bf16.mxu1 %v3380_v19 }
 0x2bc   :  { %2366 = vmatpush1.bf16.msra.mxu0 %v3398_v27  ;;  %2398 = vmatpush1.bf16.msra.mxu1 %v3400_v28 }
 0x2bd   :  { %2368 = vmatprep.subr.bf16.mxu0 %v3419_v35  ;;  %2400 = vmatprep.subr.bf16.mxu1 %v3421_v38 }
 0x2c0   :  { %2370 = vmatpush1.bf16.msra.mxu0 %v3427_v40  ;;  %2402 = vmatpush1.bf16.msra.mxu1 %v3429_v41 }
 0x2c1   :  { %2404 = vmatprep.subr.bf16.mxu0 %v3120_v47  ;;  %2436 = vmatprep.subr.bf16.mxu1 %v3122_v48 }
 0x376   :  { %v887_v0 = vpop.f32.mrb[4].mxu0  ;;  %v958_v1 = vpop.f32.mrb[4].mxu1 }
 0x377   :  { %v2006_v4 = vmul.f32 -1.442695, %v887_v0  ;;  %v889_v7 = vpop.f32.mrb[5].mxu0  ;;  %v960_v12 = vpop.f32.mrb[5].mxu1 }
 0x378   :  { %v2007_v13 = vmul.f32 -1.442695, %v889_v7  ;;  %v2008_v14 = vmul.f32 -1.442695, %v960_v12 }
 0x379   :  { %2754 = vpow2.f32 %v2006_v4 }
 0x37a   :  { %2756 = vpow2.f32 %v2007_v13 }
 0x37b   :  { %2758 = vpow2.f32 %v2008_v14 }
 0x37c   :  { %2760 = vtanh.f32 %v958_v1 }
 0x383   :  { %v2755_v15 = vpop.eup %2754 }
 0x384   :  { %v2757_v20 = vpop.eup %2756  ;;  %v970_v21 = vadd.f32 1.0, %v2755_v15 }
 0x385   :  { %v976_v22 = vadd.f32 1.0, %v2757_v20  ;;  %v2759_v23 = vpop.eup %2758 }
 0x386   :  { %2762 = vrcp.f32 %v970_v21  ;;  %v2761_v26 = vpop.eup %2760  ;;  %v983_v34 = vadd.f32 1.0, %v2759_v23 }
 0x387   :  { %2764 = vrcp.f32 %v976_v22 }
 0x388   :  { %2766 = vrcp.f32 %v983_v34 }
 0x390   :  { %v2763_v29 = vpop.eup %2762 }
 0x391   :  { %v2765_v32 = vpop.eup %2764  ;;  %v987_v33 = vmul.f32 %v2763_v29, %v2761_v26 }
 0x392   :  { %v986_v39 = vmul.f32 %v2765_v32, %v3521_v56  ;;  %v2767_v5 = vpop.eup %2766 }
 0x394   :  { %v3562_v54 = vadd.f32 %v987_v33, %v986_v39 }
 0x396   :  { %2768 = vtanh.f32 %v3562_v54 }
 0x3a0   :  { %v2769_v42 = vpop.eup %2768 }
 0x3a1   :  { %v990_v45 = vmul.f32 %v2769_v42, %v2767_v5 }
 0x3a3   :  { %2009 = vst [vmem:[%s3792_s5 + $0x10] sm:$0xff] %v990_v45  ;;  %1062 = vmatmul.mubr.f32.vlgmr.msra.gmra.mrb[6].mxu0 %v990_v45  ;;  %1133 = vmatmul.mubr.f32.vlgmr.msra.gmra.mrb[6].mxu1 %v990_v45 }
 0x3a4   :  { %2406 = vmatpush1.bf16.msra.mxu0 %v3152_v59  ;;  %2438 = vmatpush1.bf16.msra.mxu1 %v3154_v60 }
 0x3a5   :  { %2408 = vmatprep.subr.bf16.mxu0 %v3169_v2  ;;  %2440 = vmatprep.subr.bf16.mxu1 %v3171_v3 }
 0x3a6   :  { %1237 = vmatprep.mubr.f32.mxu0 %v2851_v6  ;;  %1308 = vmatprep.mubr.f32.mxu1 %v2851_v6 }
 0x3a8   :  { %2410 = vmatpush1.bf16.msra.mxu0 %v3189_v10  ;;  %2442 = vmatpush1.bf16.msra.mxu1 %v3191_v11 }
 0x3a9   :  { %2412 = vmatprep.subr.bf16.mxu0 %v3210_v17  ;;  %2444 = vmatprep.subr.bf16.mxu1 %v3212_v18 }
 0x3ac   :  { %2414 = vmatpush1.bf16.msra.mxu0 %v3231_v24  ;;  %2446 = vmatpush1.bf16.msra.mxu1 %v3233_v25 }
 0x3ad   :  { %2416 = vmatprep.subr.bf16.mxu0 %v3251_v30  ;;  %2448 = vmatprep.subr.bf16.mxu1 %v3253_v31 }
 0x3b0   :  { %2418 = vmatpush1.bf16.msra.mxu0 %v3275_v36  ;;  %2450 = vmatpush1.bf16.msra.mxu1 %v3277_v37 }
 0x3b1   :  { %2420 = vmatprep.subr.bf16.mxu0 %v3296_v43  ;;  %2452 = vmatprep.subr.bf16.mxu1 %v3298_v44 }
 0x3b4   :  { %2422 = vmatpush1.bf16.msra.mxu0 %v3316_v52  ;;  %2454 = vmatpush1.bf16.msra.mxu1 %v3318_v53 }
 0x3b5   :  { %2424 = vmatprep.subr.bf16.mxu0 %v3337_v61  ;;  %2456 = vmatprep.subr.bf16.mxu1 %v3339_v62 }
 0x3b8   :  { %2426 = vmatpush1.bf16.msra.mxu0 %v3357_v8  ;;  %2458 = vmatpush1.bf16.msra.mxu1 %v3359_v9 }
 0x3b9   :  { %2428 = vmatprep.subr.bf16.mxu0 %v3378_v16  ;;  %2460 = vmatprep.subr.bf16.mxu1 %v3380_v19 }
 0x3bc   :  { %2430 = vmatpush1.bf16.msra.mxu0 %v3398_v27  ;;  %2462 = vmatpush1.bf16.msra.mxu1 %v3400_v28 }
 0x3bd   :  { %2432 = vmatprep.subr.bf16.mxu0 %v3419_v35  ;;  %2464 = vmatprep.subr.bf16.mxu1 %v3421_v38 }
 0x3c0   :  { %2434 = vmatpush1.bf16.msra.mxu0 %v3427_v40  ;;  %2466 = vmatpush1.bf16.msra.mxu1 %v3429_v41 }
 0x3c1   :  { %2468 = vmatprep.subr.bf16.mxu0 %v3120_v47  ;;  %2500 = vmatprep.subr.bf16.mxu1 %v3122_v48 }
 0x476   :  { %v1063_v46 = vpop.f32.mrb[6].mxu0  ;;  %v1134_v49 = vpop.f32.mrb[6].mxu1 }
 0x477   :  { %v2010_v50 = vmul.f32 -1.442695, %v1063_v46  ;;  %v1065_v51 = vpop.f32.mrb[7].mxu0  ;;  %v1136_v55 = vpop.f32.mrb[7].mxu1 }
 0x478   :  { %v2011_v56 = vmul.f32 -1.442695, %v1065_v51  ;;  %v2012_v57 = vmul.f32 -1.442695, %v1136_v55 }
 0x479   :  { %2770 = vpow2.f32 %v2010_v50 }
 0x47a   :  { %2772 = vpow2.f32 %v2011_v56 }
 0x47b   :  { %2774 = vpow2.f32 %v2012_v57 }
 0x47c   :  { %2776 = vtanh.f32 %v1134_v49 }
 0x483   :  { %v2771_v58 = vpop.eup %2770 }
 0x484   :  { %v2773_v63 = vpop.eup %2772  ;;  %v1146_v0 = vadd.f32 1.0, %v2771_v58 }
 0x485   :  { %v1152_v1 = vadd.f32 1.0, %v2773_v63  ;;  %v2775_v4 = vpop.eup %2774 }
 0x486   :  { %2778 = vrcp.f32 %v1146_v0  ;;  %v2777_v7 = vpop.eup %2776  ;;  %v1159_v15 = vadd.f32 1.0, %v2775_v4 }
 0x487   :  { %2780 = vrcp.f32 %v1152_v1 }
 0x488   :  { %2782 = vrcp.f32 %v1159_v15 }
 0x490   :  { %v2779_v12 = vpop.eup %2778 }
 0x491   :  { %v2781_v13 = vpop.eup %2780  ;;  %v1163_v14 = vmul.f32 %v2779_v12, %v2777_v7 }
 0x492   :  { %v1162_v20 = vmul.f32 %v2781_v13, %v3562_v54  ;;  %v2783_v22 = vpop.eup %2782 }
 0x494   :  { %v3603_v21 = vadd.f32 %v1163_v14, %v1162_v20 }
 0x496   :  { %2784 = vtanh.f32 %v3603_v21 }
 0x4a0   :  { %v2785_v23 = vpop.eup %2784 }
 0x4a1   :  { %v1166_v26 = vmul.f32 %v2785_v23, %v2783_v22 }
 0x4a3   :  { %2013 = vst [vmem:[%s3792_s5 + $0x18] sm:$0xff] %v1166_v26  ;;  %1238 = vmatmul.mubr.f32.vlgmr.msra.gmra.mrb[8].mxu0 %v1166_v26  ;;  %1309 = vmatmul.mubr.f32.vlgmr.msra.gmra.mrb[8].mxu1 %v1166_v26 }
 0x4a4   :  { %2470 = vmatpush1.bf16.msra.mxu0 %v3152_v59  ;;  %2502 = vmatpush1.bf16.msra.mxu1 %v3154_v60 }
 0x4a5   :  { %2472 = vmatprep.subr.bf16.mxu0 %v3169_v2  ;;  %2504 = vmatprep.subr.bf16.mxu1 %v3171_v3 }
 0x4a6   :  { %1413 = vmatprep.mubr.f32.mxu0 %v2851_v6  ;;  %1484 = vmatprep.mubr.f32.mxu1 %v2851_v6 }
 0x4a8   :  { %2474 = vmatpush1.bf16.msra.mxu0 %v3189_v10  ;;  %2506 = vmatpush1.bf16.msra.mxu1 %v3191_v11 }
 0x4a9   :  { %2476 = vmatprep.subr.bf16.mxu0 %v3210_v17  ;;  %2508 = vmatprep.subr.bf16.mxu1 %v3212_v18 }
 0x4ac   :  { %2478 = vmatpush1.bf16.msra.mxu0 %v3231_v24  ;;  %2510 = vmatpush1.bf16.msra.mxu1 %v3233_v25 }
 0x4ad   :  { %2480 = vmatprep.subr.bf16.mxu0 %v3251_v30  ;;  %2512 = vmatprep.subr.bf16.mxu1 %v3253_v31 }
 0x4b0   :  { %2482 = vmatpush1.bf16.msra.mxu0 %v3275_v36  ;;  %2514 = vmatpush1.bf16.msra.mxu1 %v3277_v37 }
 0x4b1   :  { %2484 = vmatprep.subr.bf16.mxu0 %v3296_v43  ;;  %2516 = vmatprep.subr.bf16.mxu1 %v3298_v44 }
 0x4b4   :  { %2486 = vmatpush1.bf16.msra.mxu0 %v3316_v52  ;;  %2518 = vmatpush1.bf16.msra.mxu1 %v3318_v53 }
 0x4b5   :  { %2488 = vmatprep.subr.bf16.mxu0 %v3337_v61  ;;  %2520 = vmatprep.subr.bf16.mxu1 %v3339_v62 }
 0x4b8   :  { %2490 = vmatpush1.bf16.msra.mxu0 %v3357_v8  ;;  %2522 = vmatpush1.bf16.msra.mxu1 %v3359_v9 }
 0x4b9   :  { %2492 = vmatprep.subr.bf16.mxu0 %v3378_v16  ;;  %2524 = vmatprep.subr.bf16.mxu1 %v3380_v19 }
 0x4bc   :  { %2494 = vmatpush1.bf16.msra.mxu0 %v3398_v27  ;;  %2526 = vmatpush1.bf16.msra.mxu1 %v3400_v28 }
 0x4bd   :  { %2496 = vmatprep.subr.bf16.mxu0 %v3419_v35  ;;  %2528 = vmatprep.subr.bf16.mxu1 %v3421_v38 }
 0x4c0   :  { %2498 = vmatpush1.bf16.msra.mxu0 %v3427_v40  ;;  %2530 = vmatpush1.bf16.msra.mxu1 %v3429_v41 }
 0x4c1   :  { %2532 = vmatprep.subr.bf16.mxu0 %v3120_v47  ;;  %2564 = vmatprep.subr.bf16.mxu1 %v3122_v48 }
 0x576   :  { %v1239_v29 = vpop.f32.mrb[8].mxu0  ;;  %v1310_v32 = vpop.f32.mrb[8].mxu1 }
 0x577   :  { %v2014_v33 = vmul.f32 -1.442695, %v1239_v29  ;;  %v1241_v34 = vpop.f32.mrb[9].mxu0  ;;  %v1312_v39 = vpop.f32.mrb[9].mxu1 }
 0x578   :  { %v2015_v54 = vmul.f32 -1.442695, %v1241_v34  ;;  %v2016_v5 = vmul.f32 -1.442695, %v1312_v39 }
 0x579   :  { %2786 = vpow2.f32 %v2014_v33 }
 0x57a   :  { %2788 = vpow2.f32 %v2015_v54 }
 0x57b   :  { %2790 = vpow2.f32 %v2016_v5 }
 0x57c   :  { %2792 = vtanh.f32 %v1310_v32 }
 0x583   :  { %v2787_v42 = vpop.eup %2786 }
 0x584   :  { %v2789_v45 = vpop.eup %2788  ;;  %v1322_v46 = vadd.f32 1.0, %v2787_v42 }
 0x585   :  { %v1328_v49 = vadd.f32 1.0, %v2789_v45  ;;  %v2791_v50 = vpop.eup %2790 }
 0x586   :  { %2794 = vrcp.f32 %v1322_v46  ;;  %v2793_v51 = vpop.eup %2792  ;;  %v1335_v58 = vadd.f32 1.0, %v2791_v50  ;;  %v1878_v50 = vld [vmem:[%s3793_s3 + $0x28] sm:$0xff] }
 0x587   :  { %2796 = vrcp.f32 %v1328_v49 }
 0x588   :  { %2798 = vrcp.f32 %v1335_v58  ;;  %v1881_v58 = vld [vmem:[%s3793_s3 + $0x40] sm:$0xff] }
 0x590   :  { %v2795_v55 = vpop.eup %2794 }
 0x591   :  { %v2797_v56 = vpop.eup %2796  ;;  %v1339_v57 = vmul.f32 %v2795_v55, %v2793_v51  ;;  %v1879_v55 = vld [vmem:[%s3793_s3 + $0x30] sm:$0xff] }
 0x592   :  { %v1338_v63 = vmul.f32 %v2797_v56, %v3603_v21  ;;  %v2799_v1 = vpop.eup %2798  ;;  %v1880_v56 = vld [vmem:[%s3793_s3 + $0x38] sm:$0xff] }
 0x594   :  { %v3644_v0 = vadd.f32 %v1339_v57, %v1338_v63  ;;  %v2669_v57 = vpack.c.bf16 %v1880_v56, %v1879_v55  ;;  %v1882_v63 = vld [vmem:[%s3793_s3 + $0x48] sm:$0xff] }
 0x596   :  { %2800 = vtanh.f32 %v3644_v0 }
 0x5a0   :  { %v2801_v4 = vpop.eup %2800 }
 0x5a1   :  { %v1342_v7 = vmul.f32 %v2801_v4, %v2799_v1  ;;  %v1883_v1 = vld [vmem:[%s3793_s3 + $0x50] sm:$0xff]  ;;  %v1884_v4 = vld [vmem:[%s3793_s3 + $0x58] sm:$0xff] }
 0x5a3   :  { %2017 = vst [vmem:[%s3792_s5 + $0x20] sm:$0xff] %v1342_v7  ;;  %1414 = vmatmul.mubr.f32.vlgmr.msra.gmra.mrb[10].mxu0 %v1342_v7  ;;  %1485 = vmatmul.mubr.f32.vlgmr.msra.gmra.mrb[10].mxu1 %v1342_v7  ;;  %v1885_v7 = vld [vmem:[%s3793_s3 + $0x60] sm:$0xff] }
 0x5a4   :  { %2534 = vmatpush1.bf16.msra.mxu0 %v3152_v59  ;;  %2566 = vmatpush1.bf16.msra.mxu1 %v3154_v60 }
 0x5a5   :  { %2536 = vmatprep.subr.bf16.mxu0 %v3169_v2  ;;  %2568 = vmatprep.subr.bf16.mxu1 %v3171_v3 }
 0x5a6   :  { %1589 = vmatprep.mubr.f32.mxu0 %v2851_v6  ;;  %1660 = vmatprep.mubr.f32.mxu1 %v2851_v6 }
 0x5a8   :  { %2538 = vmatpush1.bf16.msra.mxu0 %v3189_v10  ;;  %2570 = vmatpush1.bf16.msra.mxu1 %v3191_v11 }
 0x5a9   :  { %2540 = vmatprep.subr.bf16.mxu0 %v3210_v17  ;;  %2572 = vmatprep.subr.bf16.mxu1 %v3212_v18 }
 0x5ac   :  { %2542 = vmatpush1.bf16.msra.mxu0 %v3231_v24  ;;  %2574 = vmatpush1.bf16.msra.mxu1 %v3233_v25 }
 0x5ad   :  { %2544 = vmatprep.subr.bf16.mxu0 %v3251_v30  ;;  %2576 = vmatprep.subr.bf16.mxu1 %v3253_v31 }
 0x5b0   :  { %2546 = vmatpush1.bf16.msra.mxu0 %v3275_v36  ;;  %2578 = vmatpush1.bf16.msra.mxu1 %v3277_v37 }
 0x5b1   :  { %2548 = vmatprep.subr.bf16.mxu0 %v3296_v43  ;;  %2580 = vmatprep.subr.bf16.mxu1 %v3298_v44 }
 0x5b4   :  { %2550 = vmatpush1.bf16.msra.mxu0 %v3316_v52  ;;  %2582 = vmatpush1.bf16.msra.mxu1 %v3318_v53 }
 0x5b5   :  { %2552 = vmatprep.subr.bf16.mxu0 %v3337_v61  ;;  %2584 = vmatprep.subr.bf16.mxu1 %v3339_v62 }
 0x5b8   :  { %2554 = vmatpush1.bf16.msra.mxu0 %v3357_v8  ;;  %2586 = vmatpush1.bf16.msra.mxu1 %v3359_v9 }
 0x5b9   :  { %2556 = vmatprep.subr.bf16.mxu0 %v3378_v16  ;;  %2588 = vmatprep.subr.bf16.mxu1 %v3380_v19 }
 0x5bc   :  { %2558 = vmatpush1.bf16.msra.mxu0 %v3398_v27  ;;  %2590 = vmatpush1.bf16.msra.mxu1 %v3400_v28 }
 0x5bd   :  { %2560 = vmatprep.subr.bf16.mxu0 %v3419_v35  ;;  %2592 = vmatprep.subr.bf16.mxu1 %v3421_v38 }
 0x5c0   :  { %2562 = vmatpush1.bf16.msra.mxu0 %v3427_v40  ;;  %2594 = vmatpush1.bf16.msra.mxu1 %v3429_v41 }
 0x5c1   :  { %2596 = vmatprep.subr.bf16.mxu0 %v3120_v47  ;;  %2628 = vmatprep.subr.bf16.mxu1 %v3122_v48 }
 0x676   :  { %v1415_v12 = vpop.f32.mrb[10].mxu0  ;;  %v1486_v13 = vpop.f32.mrb[10].mxu1 }
 0x677   :  { %v2018_v14 = vmul.f32 -1.442695, %v1415_v12  ;;  %v1417_v15 = vpop.f32.mrb[11].mxu0  ;;  %v1488_v20 = vpop.f32.mrb[11].mxu1  ;;  %v2675_v12 = vpack.c.bf16 %v1884_v4, %v1883_v1 }
 0x678   :  { %v2019_v21 = vmul.f32 -1.442695, %v1417_v15  ;;  %v2020_v22 = vmul.f32 -1.442695, %v1488_v20  ;;  %v1887_v15 = vld [vmem:[%s3793_s3 + $0x70] sm:$0xff]  ;;  %v1888_v20 = vld [vmem:[%s3793_s3 + $0x78] sm:$0xff] }
 0x679   :  { %2802 = vpow2.f32 %v2018_v14 }
 0x67a   :  { %2804 = vpow2.f32 %v2019_v21  ;;  %v2681_v21 = vpack.c.bf16 %v1888_v20, %v1887_v15 }
 0x67b   :  { %2806 = vpow2.f32 %v2020_v22 }
 0x67c   :  { %2808 = vtanh.f32 %v1486_v13  ;;  %v1886_v13 = vld [vmem:[%s3793_s3 + $0x68] sm:$0xff] }
 0x67d   :  { %v2678_v14 = vpack.c.bf16 %v1886_v13, %v1885_v7 }
 0x683   :  { %v2803_v23 = vpop.eup %2802 }
 0x684   :  { %v2805_v26 = vpop.eup %2804  ;;  %v1498_v29 = vadd.f32 1.0, %v2803_v23 }
 0x685   :  { %v1504_v32 = vadd.f32 1.0, %v2805_v26  ;;  %v2807_v47 = vpop.eup %2806 }
 0x686   :  { %2810 = vrcp.f32 %v1498_v29  ;;  %v2809_v33 = vpop.eup %2808  ;;  %v1511_v54 = vadd.f32 1.0, %v2807_v47 }
 0x687   :  { %2812 = vrcp.f32 %v1504_v32 }
 0x688   :  { %2814 = vrcp.f32 %v1511_v54 }
 0x690   :  { %v2811_v48 = vpop.eup %2810 }
 0x691   :  { %v2813_v34 = vpop.eup %2812  ;;  %v1515_v39 = vmul.f32 %v2811_v48, %v2809_v33 }
 0x692   :  { %v1514_v5 = vmul.f32 %v2813_v34, %v3644_v0  ;;  %v2815_v45 = vpop.eup %2814  ;;  %v2672_v0 = vpack.c.bf16 %v1882_v63, %v1881_v58 }
 0x694   :  { %v3685_v42 = vadd.f32 %v1515_v39, %v1514_v5 }
 0x696   :  { %2816 = vtanh.f32 %v3685_v42 }
 0x6a0   :  { %v2817_v46 = vpop.eup %2816 }
 0x6a1   :  { %v1518_v49 = vmul.f32 %v2817_v46, %v2815_v45 }
 0x6a3   :  { %2021 = vst [vmem:[%s3792_s5 + $0x28] sm:$0xff] %v1518_v49  ;;  %1590 = vmatmul.mubr.f32.vlgmr.msra.gmra.mrb[12].mxu0 %v1518_v49  ;;  %1661 = vmatmul.mubr.f32.vlgmr.msra.gmra.mrb[12].mxu1 %v1518_v49 }
 0x6a4   :  { %2598 = vmatpush1.bf16.msra.mxu0 %v3152_v59  ;;  %2630 = vmatpush1.bf16.msra.mxu1 %v3154_v60 }
 0x6a5   :  { %2600 = vmatprep.subr.bf16.mxu0 %v3169_v2  ;;  %2632 = vmatprep.subr.bf16.mxu1 %v3171_v3 }
 0x6a6   :  { %1765 = vmatprep.mubr.f32.mxu0 %v2851_v6  ;;  %1836 = vmatprep.mubr.f32.mxu1 %v2851_v6 }
 0x6a8   :  { %2602 = vmatpush1.bf16.msra.mxu0 %v3189_v10  ;;  %2634 = vmatpush1.bf16.msra.mxu1 %v3191_v11 }
 0x6a9   :  { %2604 = vmatprep.subr.bf16.mxu0 %v3210_v17  ;;  %2636 = vmatprep.subr.bf16.mxu1 %v3212_v18 }
 0x6ac   :  { %2606 = vmatpush1.bf16.msra.mxu0 %v3231_v24  ;;  %2638 = vmatpush1.bf16.msra.mxu1 %v3233_v25 }
 0x6ad   :  { %2608 = vmatprep.subr.bf16.mxu0 %v3251_v30  ;;  %2640 = vmatprep.subr.bf16.mxu1 %v3253_v31 }
 0x6b0   :  { %2610 = vmatpush1.bf16.msra.mxu0 %v3275_v36  ;;  %2642 = vmatpush1.bf16.msra.mxu1 %v3277_v37 }
 0x6b1   :  { %2612 = vmatprep.subr.bf16.mxu0 %v3296_v43  ;;  %2644 = vmatprep.subr.bf16.mxu1 %v3298_v44 }
 0x6b4   :  { %2614 = vmatpush1.bf16.msra.mxu0 %v3316_v52  ;;  %2646 = vmatpush1.bf16.msra.mxu1 %v3318_v53 }
 0x6b5   :  { %2616 = vmatprep.subr.bf16.mxu0 %v3337_v61  ;;  %2648 = vmatprep.subr.bf16.mxu1 %v3339_v62 }
 0x6b8   :  { %2618 = vmatpush1.bf16.msra.mxu0 %v3357_v8  ;;  %2650 = vmatpush1.bf16.msra.mxu1 %v3359_v9 }
 0x6b9   :  { %2620 = vmatprep.subr.bf16.mxu0 %v3378_v16  ;;  %2652 = vmatprep.subr.bf16.mxu1 %v3380_v19  ;;  %v1873_v16 = vld [vmem:[%s3793_s3] sm:$0xff]  ;;  %v1874_v19 = vld [vmem:[%s3793_s3 + $0x8] sm:$0xff] }
 0x6bc   :  { %2622 = vmatpush1.bf16.msra.mxu0 %v3398_v27  ;;  %2654 = vmatpush1.bf16.msra.mxu1 %v3400_v28  ;;  %v2660_v27 = vpack.c.bf16 %v1874_v19, %v1873_v16  ;;  %v2853_v28 = vmov 0.0|0.0  }
 0x6bd   :  { %2624 = vmatprep.subr.bf16.mxu0 %v3419_v35  ;;  %2656 = vmatprep.subr.bf16.mxu1 %v3421_v38  ;;  %v1875_v35 = vld [vmem:[%s3793_s3 + $0x10] sm:$0xff]  ;;  %v1876_v38 = vld [vmem:[%s3793_s3 + $0x18] sm:$0xff] }
 0x6c0   :  { %2626 = vmatpush1.bf16.msra.mxu0 %v3427_v40  ;;  %2658 = vmatpush1.bf16.msra.mxu1 %v3429_v41  ;;  %v2663_v40 = vpack.c.bf16 %v1876_v38, %v1875_v35  ;;  %v1877_v41 = vld [vmem:[%s3793_s3 + $0x20] sm:$0xff] }
 0x6c1   :  { %2659 = vmatprep.subr.bf16.mxu0 %v2853_v28  ;;  %v2666_v51 = vpack.c.bf16 %v1878_v50, %v1877_v41 }
 0x776   :  { %v1591_v59 = vpop.f32.mrb[12].mxu0  ;;  %v1662_v60 = vpop.f32.mrb[12].mxu1 }
 0x777   :  { %v2022_v2 = vmul.f32 -1.442695, %v1591_v59  ;;  %v1593_v3 = vpop.f32.mrb[13].mxu0  ;;  %v1664_v10 = vpop.f32.mrb[13].mxu1 }
 0x778   :  { %v2023_v11 = vmul.f32 -1.442695, %v1593_v3  ;;  %v2024_v17 = vmul.f32 -1.442695, %v1664_v10 }
 0x779   :  { %2818 = vpow2.f32 %v2022_v2 }
 0x77a   :  { %2820 = vpow2.f32 %v2023_v11  ;;  %v2030_v11 = vld [vmem:[%s3794_s4] ss:$0 sm:$0xff] }
 0x77b   :  { %2822 = vpow2.f32 %v2024_v17 }
 0x77c   :  { %2824 = vtanh.f32 %v1662_v60 }
 0x783   :  { %v2819_v18 = vpop.eup %2818 }
 0x784   :  { %v2821_v24 = vpop.eup %2820  ;;  %v1674_v25 = vadd.f32 1.0, %v2819_v18 }
 0x785   :  { %v1680_v30 = vadd.f32 1.0, %v2821_v24  ;;  %v2823_v31 = vpop.eup %2822 }
 0x786   :  { %2826 = vrcp.f32 %v1674_v25  ;;  %v2825_v36 = vpop.eup %2824  ;;  %v1687_v52 = vadd.f32 1.0, %v2823_v31 }
 0x787   :  { %2828 = vrcp.f32 %v1680_v30 }
 0x788   :  { %2830 = vrcp.f32 %v1687_v52 }
 0x790   :  { %v2827_v37 = vpop.eup %2826 }
 0x791   :  { %v2829_v43 = vpop.eup %2828  ;;  %v1691_v44 = vmul.f32 %v2827_v37, %v2825_v36 }
 0x792   :  { %v1690_v53 = vmul.f32 %v2829_v43, %v3685_v42  ;;  %v2831_v62 = vpop.eup %2830 }
 0x794   :  { %v3724_v61 = vadd.f32 %v1691_v44, %v1690_v53 }
 0x796   :  { %2832 = vtanh.f32 %v3724_v61 }
 0x7a0   :  { %v2833_v8 = vpop.eup %2832 }
 0x7a1   :  { %v1694_v9 = vmul.f32 %v2833_v8, %v2831_v62 }
 0x7a3   :  { %2025 = vst [vmem:[%s3792_s5 + $0x30] sm:$0xff] %v1694_v9  ;;  %1766 = vmatmul.mubr.f32.vlgmr.msra.gmra.mrb[14].mxu0 %v1694_v9  ;;  %1837 = vmatmul.mubr.f32.vlgmr.msra.gmra.mrb[14].mxu1 %v1694_v9 }
 0x7a4   :  { %2661 = vmatpush3.bf16.msra.mxu0 %v2660_v27  ;;  %2080 = vmatprep.mubr.msk.f32.mxu0 %vm2854_vm8, %v2851_v6 }
 0x7a5   :  { %2662 = vmatprep.subr.bf16.mxu0 %v2853_v28 }
 0x7a8   :  { %2664 = vmatpush3.bf16.msra.mxu0 %v2663_v40 }
 0x7a9   :  { %2665 = vmatprep.subr.bf16.mxu0 %v2853_v28 }
 0x7ac   :  { %2667 = vmatpush3.bf16.msra.mxu0 %v2666_v51 }
 0x7ad   :  { %2668 = vmatprep.subr.bf16.mxu0 %v2853_v28 }
 0x7b0   :  { %2670 = vmatpush3.bf16.msra.mxu0 %v2669_v57 }
 0x7b1   :  { %2671 = vmatprep.subr.bf16.mxu0 %v2853_v28 }
 0x7b4   :  { %2673 = vmatpush3.bf16.msra.mxu0 %v2672_v0 }
 0x7b5   :  { %2674 = vmatprep.subr.bf16.mxu0 %v2853_v28 }
 0x7b8   :  { %2676 = vmatpush3.bf16.msra.mxu0 %v2675_v12 }
 0x7b9   :  { %2677 = vmatprep.subr.bf16.mxu0 %v2853_v28 }
 0x7bc   :  { %2679 = vmatpush3.bf16.msra.mxu0 %v2678_v14 }
 0x7bd   :  { %2680 = vmatprep.subr.bf16.mxu0 %v2853_v28 }
 0x7c0   :  { %2682 = vmatpush3.bf16.msra.mxu0 %v2681_v21 }
 0x876   :  { %v1767_v22 = vpop.f32.mrb[14].mxu0  ;;  %v1838_v23 = vpop.f32.mrb[14].mxu1 }
 0x877   :  { %v2026_v26 = vmul.f32 -1.442695, %v1767_v22  ;;  %v1769_v29 = vpop.f32.mrb[15].mxu0  ;;  %v1840_v6 = vpop.f32.mrb[15].mxu1 }
 0x878   :  { %v2027_v32 = vmul.f32 -1.442695, %v1769_v29  ;;  %v2028_v47 = vmul.f32 -1.442695, %v1840_v6 }
 0x879   :  { %2834 = vpow2.f32 %v2026_v26 }
 0x87a   :  { %2836 = vpow2.f32 %v2027_v32 }
 0x87b   :  { %2838 = vpow2.f32 %v2028_v47 }
 0x87c   :  { %2840 = vtanh.f32 %v1838_v23 }
 0x883   :  { %v2835_v33 = vpop.eup %2834 }
 0x884   :  { %v2837_v48 = vpop.eup %2836  ;;  %v1850_v34 = vadd.f32 1.0, %v2835_v33 }
 0x885   :  { %v1856_v39 = vadd.f32 1.0, %v2837_v48  ;;  %v2839_v54 = vpop.eup %2838 }
 0x886   :  { %2842 = vrcp.f32 %v1850_v34  ;;  %v2841_v5 = vpop.eup %2840  ;;  %v1863_v49 = vadd.f32 1.0, %v2839_v54 }
 0x887   :  { %2844 = vrcp.f32 %v1856_v39 }
 0x888   :  { %2846 = vrcp.f32 %v1863_v49 }
 0x890   :  { %v2843_v42 = vpop.eup %2842 }
 0x891   :  { %v2845_v45 = vpop.eup %2844  ;;  %v1867_v46 = vmul.f32 %v2843_v42, %v2841_v5 }
 0x892   :  { %v1866_v59 = vmul.f32 %v2845_v45, %v3724_v61  ;;  %v2847_v2 = vpop.eup %2846 }
 0x894   :  { %v1868_v60 = vadd.f32 %v1867_v46, %v1866_v59 }
 0x896   :  { %2848 = vtanh.f32 %v1868_v60 }
 0x8a0   :  { %v2849_v3 = vpop.eup %2848 }
 0x8a1   :  { %v1870_v10 = vmul.f32 %v2849_v3, %v2847_v2 }
 0x8a3   :  { %2029 = vst [vmem:[%s3792_s5 + $0x38] sm:$0xff] %v1870_v10  ;;  %2081 = vmatmul.mubr.f32.vlgmr.msra.gmra.mrb[16].mxu0 %v1870_v10 }
 0x976   :  { %v1962_v17 = vpop.f32.mrb[16].mxu0 }
 0x977   :  { %v1963_v18 = vadd.f32 %v2030_v11, %v1962_v17  ;;  %v2082_v24 = vpop.f32.mrb[17].mxu0 }
 0x979   :  { %1966 = vst [vmem:[%s3795_s6] sm:$0xff] %v1963_v18 }

</bundles_post_ra>
